<compile_context>
chip_gen: v7x
topology: tpu7x:2x2x1
jax: 0.10.0
libtpu: 0.0.40
codegen_flags: <defaults>
</compile_context>

<pallas_src>
import jax
import jax.numpy as jnp
from jax import lax
from jax.experimental import pallas as pl
from jax.experimental.pallas import tpu as pltpu

H_DIMS = 32
Y_DIMS = 8
BN_EPS = 1e-5
VMEM_LIMIT_BYTES = 48 * 1024 * 1024   # safe on v7x (64 MiB physical) and v5e/v6e


def _gelu_tanh(x):
    # TODO(synk): PyTorch nn.GELU() default is the exact erf form; the tanh
    # approximation is used since erf has no guaranteed Mosaic lowering.
    c = jnp.float32(0.7978845608028654)  # sqrt(2/pi)
    return 0.5 * x * (1.0 + jnp.tanh(c * (x + 0.044715 * x * x * x)))


# ---- Fused kernel: Conv2d(1->3,k3) + BN2d + ReLU + GAP + model.fc + MLP head ----
def fused_cnn_kernel(w_ref, b_ref, scale_ref, shift_ref,            # SMEM conv/BN2d
                     x_ref,                                          # VMEM (bn, H, W)
                     wm_ref, bm_ref, w1_ref, b1_ref, w2_ref, b2_ref,
                     bns_ref, bnb_ref, w3_ref, b3_ref,               # VMEM head params
                     o_ref):                                         # VMEM (bn, Y)
    x = x_ref[...]
    bn, h, w = x.shape
    ho, wo = h - 2, w - 2

    # Hoist the 9 shifted views once; reused by all 3 output channels.
    xs = [x[:, di:di + ho, dj:dj + wo] for di in range(3) for dj in range(3)]

    pooled = []
    for c in range(3):
        acc = w_ref[c * 9] * xs[0]
        for k in range(1, 9):
            acc = acc + w_ref[c * 9 + k] * xs[k]
        y = acc + b_ref[c]
        y = y * scale_ref[c] + shift_ref[c]              # BatchNorm2d (eval, folded)
        y = jnp.maximum(y, 0.0)                          # ReLU
        # Global average pool in-kernel; feature map never touches HBM.
        pooled.append(jnp.mean(jnp.mean(y, axis=-1), axis=-1, keepdims=True))  # (bn,1)

    # replaced model.fc: Linear(3 -> h_dims). K=3 is MXU-hostile -> 3 VPU FMAs.
    z = (pooled[0] * wm_ref[0:1, :] + pooled[1] * wm_ref[1:2, :]
         + pooled[2] * wm_ref[2:3, :] + bm_ref[...])

    # self.fc (n_layers=2): Linear, Linear, GELU, BN1d(eval folded), Dropout(id), Linear
    z = jnp.dot(z, w1_ref[...], preferred_element_type=jnp.float32) + b1_ref[...]
    z = jnp.dot(z, w2_ref[...], preferred_element_type=jnp.float32) + b2_ref[...]
    z = _gelu_tanh(z)
    z = z * bns_ref[...] + bnb_ref[...]                  # BatchNorm1d (eval, folded)
    o_ref[...] = jnp.dot(z, w3_ref[...], preferred_element_type=jnp.float32) + b3_ref[...]


def _pick_batch_tile(n, h, w, budget_bytes=20 << 20):
    # Per-sample VMEM estimate: input plane + ~12 (ho,wo)-sized f32 temporaries,
    # double-buffered input. Keeps the working set well under VMEM_LIMIT_BYTES
    # on every generation (v7x has only 64 MiB physical VMEM).
    per_sample = 4 * (h * w + 12 * (h - 2) * (w - 2))
    cap = max(1, budget_bytes // (2 * per_sample))
    if cap >= n:
        return n
    return max(8, (cap // 8) * 8)        # sublane-friendly tile when actually tiling


# ------------------------------- Full forward ----------------------------------
def cnn_forward(x, params):
    (conv_w, conv_b, bn2_scale, bn2_shift,
     wm, bm, w1, b1, w2, b2, bns, bnb, w3, b3) = params
    x_nhw = x[:, 0, :, :]                                # squeeze single channel
    n, h, w = x_nhw.shape
    bn = _pick_batch_tile(n, h, w)
    grid = (pl.cdiv(n, bn),)

    smem = pltpu.MemorySpace.SMEM

    def smem_spec(shape):
        return pl.BlockSpec(shape, lambda i, _s=shape: (0,) * len(_s), memory_space=smem)

    def resident(shape):
        # constant index_map -> weight block stays resident across batch grid steps
        return pl.BlockSpec(shape, lambda i, _s=shape: (0,) * len(_s))

    in_specs = [
        smem_spec((27,)), smem_spec((3,)), smem_spec((3,)), smem_spec((3,)),
        pl.BlockSpec((bn, h, w), lambda i: (i, 0, 0)),
        resident((3, H_DIMS)), resident((1, H_DIMS)),
        resident((H_DIMS, H_DIMS)), resident((1, H_DIMS)),
        resident((H_DIMS, H_DIMS)), resident((1, H_DIMS)),
        resident((1, H_DIMS)), resident((1, H_DIMS)),
        resident((H_DIMS, Y_DIMS)), resident((1, Y_DIMS)),
    ]
    out_specs = pl.BlockSpec((bn, Y_DIMS), lambda i: (i, 0))

    return pl.pallas_call(
        fused_cnn_kernel,
        out_shape=jax.ShapeDtypeStruct((n, Y_DIMS), jnp.float32),
        grid=grid,
        in_specs=in_specs,
        out_specs=out_specs,
        compiler_params=pltpu.CompilerParams(
            dimension_semantics=("parallel",),
            vmem_limit_bytes=VMEM_LIMIT_BYTES),
    )(conv_w.reshape(-1), conv_b, bn2_scale, bn2_shift, x_nhw,
      wm, bm.reshape(1, -1), w1, b1.reshape(1, -1), w2, b2.reshape(1, -1),
      bns.reshape(1, -1), bnb.reshape(1, -1), w3, b3.reshape(1, -1))


# ----------------------------- Pure-JAX reference ------------------------------
def reference_forward(x, params):
    (conv_w, conv_b, bn2_scale, bn2_shift,
     wm, bm, w1, b1, w2, b2, bns, bnb, w3, b3) = params
    y = lax.conv_general_dilated(x, conv_w, (1, 1), 'VALID',
                                 dimension_numbers=('NCHW', 'OIHW', 'NCHW'))
    y = y + conv_b.reshape(1, 3, 1, 1)
    y = y * bn2_scale.reshape(1, 3, 1, 1) + bn2_shift.reshape(1, 3, 1, 1)
    y = jnp.maximum(y, 0.0)
    pooled = jnp.mean(y, axis=(2, 3))
    z = pooled @ wm + bm
    z = z @ w1 + b1
    z = z @ w2 + b2
    z = _gelu_tanh(z)
    z = z * bns + bnb
    return z @ w3 + b3


def make_params(key):
    ks = jax.random.split(key, 20)
    f32 = jnp.float32

    conv_w = 0.3 * jax.random.normal(ks[0], (3, 1, 3, 3), f32)     # OIHW
    conv_b = 0.1 * jax.random.normal(ks[1], (3,), f32)
    # BatchNorm2d(3) running stats + affine, folded to scale/shift
    g2 = 1.0 + 0.1 * jax.random.normal(ks[2], (3,), f32)
    bta2 = 0.1 * jax.random.normal(ks[3], (3,), f32)
    rm2 = 0.05 * jax.random.normal(ks[4], (3,), f32)
    rv2 = 1.0 + 0.1 * jax.random.uniform(ks[5], (3,), f32)
    bn2_scale = g2 / jnp.sqrt(rv2 + BN_EPS)
    bn2_shift = bta2 - rm2 * bn2_scale

    # stand-in model.fc: Linear(3 -> h_dims), stored as (in, out)
    wm = 0.2 * jax.random.normal(ks[6], (3, H_DIMS), f32)
    bm = 0.05 * jax.random.normal(ks[7], (H_DIMS,), f32)
    # self.fc: Linear(h,h), Linear(h,h), GELU, BN1d(h), Dropout, Linear(h,y)
    w1 = 0.2 * jax.random.normal(ks[8], (H_DIMS, H_DIMS), f32)
    b1 = 0.05 * jax.random.normal(ks[9], (H_DIMS,), f32)
    w2 = 0.2 * jax.random.normal(ks[10], (H_DIMS, H_DIMS), f32)
    b2 = 0.05 * jax.random.normal(ks[11], (H_DIMS,), f32)
    g1 = 1.0 + 0.1 * jax.random.normal(ks[12], (H_DIMS,), f32)
    bta1 = 0.1 * jax.random.normal(ks[13], (H_DIMS,), f32)
    rm1 = 0.05 * jax.random.normal(ks[14], (H_DIMS,), f32)
    rv1 = 1.0 + 0.1 * jax.random.uniform(ks[15], (H_DIMS,), f32)
    bns = g1 / jnp.sqrt(rv1 + BN_EPS)
    bnb = bta1 - rm1 * bns
    w3 = 0.2 * jax.random.normal(ks[16], (H_DIMS, Y_DIMS), f32)
    b3 = 0.05 * jax.random.normal(ks[17], (Y_DIMS,), f32)

    return (conv_w, conv_b, bn2_scale, bn2_shift,
            wm, bm, w1, b1, w2, b2, bns, bnb, w3, b3)


if __name__ == "__main__":
    key = jax.random.PRNGKey(0)
    params = make_params(key)
    x = jax.random.normal(jax.random.PRNGKey(1), (2, 1, 16, 16), jnp.float32)

    out = cnn_forward(x, params)
    out = jax.block_until_ready(out)

    ref = jax.block_until_ready(reference_forward(x, params))
    assert out.shape == (2, Y_DIMS)
    assert jnp.allclose(out, ref, rtol=1e-4, atol=1e-4), (
        f"mismatch: max abs err {jnp.max(jnp.abs(out - ref))}")
    print("KERNEL_OK")
</pallas_src>

<mosaic_0001>
module attributes {stable_mosaic.version = 11 : i64} {
  func.func @fused_cnn_kernel(%arg0: i32, %arg1: memref<27xf32, #tpu.memory_space<smem>>, %arg2: memref<3xf32, #tpu.memory_space<smem>>, %arg3: memref<3xf32, #tpu.memory_space<smem>>, %arg4: memref<3xf32, #tpu.memory_space<smem>>, %arg5: memref<2x16x16xf32, #tpu.memory_space<vmem>>, %arg6: memref<3x32xf32, #tpu.memory_space<vmem>>, %arg7: memref<1x32xf32, #tpu.memory_space<vmem>>, %arg8: memref<32x32xf32, #tpu.memory_space<vmem>>, %arg9: memref<1x32xf32, #tpu.memory_space<vmem>>, %arg10: memref<32x32xf32, #tpu.memory_space<vmem>>, %arg11: memref<1x32xf32, #tpu.memory_space<vmem>>, %arg12: memref<1x32xf32, #tpu.memory_space<vmem>>, %arg13: memref<1x32xf32, #tpu.memory_space<vmem>>, %arg14: memref<32x8xf32, #tpu.memory_space<vmem>>, %arg15: memref<1x8xf32, #tpu.memory_space<vmem>>, %arg16: memref<2x8xf32, #tpu.memory_space<vmem>>) attributes {dimension_semantics = [#tpu.dimension_semantics<parallel>], iteration_bounds = array<i64: 1>, scalar_prefetch = 0 : i64, scratch_operands = 0 : i64, tpu.core_type = #tpu.core_type<tc>, window_params = [{transform_indices = @transform_0, window_bounds = array<i64: 27>}, {transform_indices = @transform_1, window_bounds = array<i64: 3>}, {transform_indices = @transform_2, window_bounds = array<i64: 3>}, {transform_indices = @transform_3, window_bounds = array<i64: 3>}, {transform_indices = @transform_4, window_bounds = array<i64: 2, 16, 16>}, {pipeline_mode = #tpu.pipeline_mode<synchronous>, transform_indices = @transform_5, window_bounds = array<i64: 3, 32>}, {pipeline_mode = #tpu.pipeline_mode<synchronous>, transform_indices = @transform_6, window_bounds = array<i64: 1, 32>}, {pipeline_mode = #tpu.pipeline_mode<synchronous>, transform_indices = @transform_7, window_bounds = array<i64: 32, 32>}, {pipeline_mode = #tpu.pipeline_mode<synchronous>, transform_indices = @transform_8, window_bounds = array<i64: 1, 32>}, {pipeline_mode = #tpu.pipeline_mode<synchronous>, transform_indices = @transform_9, window_bounds = array<i64: 32, 32>}, {pipeline_mode = #tpu.pipeline_mode<synchronous>, transform_indices = @transform_10, window_bounds = array<i64: 1, 32>}, {pipeline_mode = #tpu.pipeline_mode<synchronous>, transform_indices = @transform_11, window_bounds = array<i64: 1, 32>}, {pipeline_mode = #tpu.pipeline_mode<synchronous>, transform_indices = @transform_12, window_bounds = array<i64: 1, 32>}, {pipeline_mode = #tpu.pipeline_mode<synchronous>, transform_indices = @transform_13, window_bounds = array<i64: 32, 8>}, {pipeline_mode = #tpu.pipeline_mode<synchronous>, transform_indices = @transform_14, window_bounds = array<i64: 1, 8>}, {transform_indices = @transform_15, window_bounds = array<i64: 2, 8>}]} {
    %c0 = arith.constant 0 : index
    %c0_0 = arith.constant 0 : index
    %c0_1 = arith.constant 0 : index
    %0 = vector.load %arg5[%c0, %c0_0, %c0_1] : memref<2x16x16xf32, #tpu.memory_space<vmem>>, vector<2x16x16xf32>
    %1 = vector.extract_strided_slice %0 {offsets = [0, 0, 0], sizes = [2, 14, 14], strides = [1, 1, 1]} : vector<2x16x16xf32> to vector<2x14x14xf32>
    %2 = vector.extract_strided_slice %0 {offsets = [0, 0, 1], sizes = [2, 14, 14], strides = [1, 1, 1]} : vector<2x16x16xf32> to vector<2x14x14xf32>
    %3 = vector.extract_strided_slice %0 {offsets = [0, 0, 2], sizes = [2, 14, 14], strides = [1, 1, 1]} : vector<2x16x16xf32> to vector<2x14x14xf32>
    %4 = vector.extract_strided_slice %0 {offsets = [0, 1, 0], sizes = [2, 14, 14], strides = [1, 1, 1]} : vector<2x16x16xf32> to vector<2x14x14xf32>
    %5 = vector.extract_strided_slice %0 {offsets = [0, 1, 1], sizes = [2, 14, 14], strides = [1, 1, 1]} : vector<2x16x16xf32> to vector<2x14x14xf32>
    %6 = vector.extract_strided_slice %0 {offsets = [0, 1, 2], sizes = [2, 14, 14], strides = [1, 1, 1]} : vector<2x16x16xf32> to vector<2x14x14xf32>
    %7 = vector.extract_strided_slice %0 {offsets = [0, 2, 0], sizes = [2, 14, 14], strides = [1, 1, 1]} : vector<2x16x16xf32> to vector<2x14x14xf32>
    %8 = vector.extract_strided_slice %0 {offsets = [0, 2, 1], sizes = [2, 14, 14], strides = [1, 1, 1]} : vector<2x16x16xf32> to vector<2x14x14xf32>
    %9 = vector.extract_strided_slice %0 {offsets = [0, 2, 2], sizes = [2, 14, 14], strides = [1, 1, 1]} : vector<2x16x16xf32> to vector<2x14x14xf32>
    %c0_2 = arith.constant 0 : index
    %10 = memref.load %arg1[%c0_2] : memref<27xf32, #tpu.memory_space<smem>>
    %11 = vector.broadcast %10 : f32 to vector<2x14x14xf32>
    %12 = arith.mulf %11, %1 : vector<2x14x14xf32>
    %c1 = arith.constant 1 : index
    %13 = memref.load %arg1[%c1] : memref<27xf32, #tpu.memory_space<smem>>
    %14 = vector.broadcast %13 : f32 to vector<2x14x14xf32>
    %15 = arith.mulf %14, %2 : vector<2x14x14xf32>
    %16 = arith.addf %12, %15 : vector<2x14x14xf32>
    %c2 = arith.constant 2 : index
    %17 = memref.load %arg1[%c2] : memref<27xf32, #tpu.memory_space<smem>>
    %18 = vector.broadcast %17 : f32 to vector<2x14x14xf32>
    %19 = arith.mulf %18, %3 : vector<2x14x14xf32>
    %20 = arith.addf %16, %19 : vector<2x14x14xf32>
    %c3 = arith.constant 3 : index
    %21 = memref.load %arg1[%c3] : memref<27xf32, #tpu.memory_space<smem>>
    %22 = vector.broadcast %21 : f32 to vector<2x14x14xf32>
    %23 = arith.mulf %22, %4 : vector<2x14x14xf32>
    %24 = arith.addf %20, %23 : vector<2x14x14xf32>
    %c4 = arith.constant 4 : index
    %25 = memref.load %arg1[%c4] : memref<27xf32, #tpu.memory_space<smem>>
    %26 = vector.broadcast %25 : f32 to vector<2x14x14xf32>
    %27 = arith.mulf %26, %5 : vector<2x14x14xf32>
    %28 = arith.addf %24, %27 : vector<2x14x14xf32>
    %c5 = arith.constant 5 : index
    %29 = memref.load %arg1[%c5] : memref<27xf32, #tpu.memory_space<smem>>
    %30 = vector.broadcast %29 : f32 to vector<2x14x14xf32>
    %31 = arith.mulf %30, %6 : vector<2x14x14xf32>
    %32 = arith.addf %28, %31 : vector<2x14x14xf32>
    %c6 = arith.constant 6 : index
    %33 = memref.load %arg1[%c6] : memref<27xf32, #tpu.memory_space<smem>>
    %34 = vector.broadcast %33 : f32 to vector<2x14x14xf32>
    %35 = arith.mulf %34, %7 : vector<2x14x14xf32>
    %36 = arith.addf %32, %35 : vector<2x14x14xf32>
    %c7 = arith.constant 7 : index
    %37 = memref.load %arg1[%c7] : memref<27xf32, #tpu.memory_space<smem>>
    %38 = vector.broadcast %37 : f32 to vector<2x14x14xf32>
    %39 = arith.mulf %38, %8 : vector<2x14x14xf32>
    %40 = arith.addf %36, %39 : vector<2x14x14xf32>
    %c8 = arith.constant 8 : index
    %41 = memref.load %arg1[%c8] : memref<27xf32, #tpu.memory_space<smem>>
    %42 = vector.broadcast %41 : f32 to vector<2x14x14xf32>
    %43 = arith.mulf %42, %9 : vector<2x14x14xf32>
    %44 = arith.addf %40, %43 : vector<2x14x14xf32>
    %c0_3 = arith.constant 0 : index
    %45 = memref.load %arg2[%c0_3] : memref<3xf32, #tpu.memory_space<smem>>
    %46 = vector.broadcast %45 : f32 to vector<2x14x14xf32>
    %47 = arith.addf %44, %46 : vector<2x14x14xf32>
    %c0_4 = arith.constant 0 : index
    %48 = memref.load %arg3[%c0_4] : memref<3xf32, #tpu.memory_space<smem>>
    %49 = vector.broadcast %48 : f32 to vector<2x14x14xf32>
    %50 = arith.mulf %47, %49 : vector<2x14x14xf32>
    %c0_5 = arith.constant 0 : index
    %51 = memref.load %arg4[%c0_5] : memref<3xf32, #tpu.memory_space<smem>>
    %52 = vector.broadcast %51 : f32 to vector<2x14x14xf32>
    %53 = arith.addf %50, %52 : vector<2x14x14xf32>
    %cst = arith.constant 0.000000e+00 : f32
    %54 = vector.broadcast %cst : f32 to vector<2x14x14xf32>
    %55 = arith.maximumf %53, %54 : vector<2x14x14xf32>
    %cst_6 = arith.constant dense<0.000000e+00> : vector<2x14xf32>
    %56 = vector.multi_reduction <add>, %55, %cst_6 [2] : vector<2x14x14xf32> to vector<2x14xf32>
    %cst_7 = arith.constant 1.400000e+01 : f32
    %57 = vector.broadcast %cst_7 : f32 to vector<2x14xf32>
    %58 = arith.divf %56, %57 : vector<2x14xf32>
    %cst_8 = arith.constant dense<0.000000e+00> : vector<2xf32>
    %59 = vector.multi_reduction <add>, %58, %cst_8 [1] : vector<2x14xf32> to vector<2xf32>
    %60 = vector.shape_cast %59 : vector<2xf32> to vector<2x1xf32>
    %cst_9 = arith.constant 1.400000e+01 : f32
    %61 = vector.broadcast %cst_9 : f32 to vector<2x1xf32>
    %62 = arith.divf %60, %61 : vector<2x1xf32>
    %c9 = arith.constant 9 : index
    %63 = memref.load %arg1[%c9] : memref<27xf32, #tpu.memory_space<smem>>
    %64 = vector.broadcast %63 : f32 to vector<2x14x14xf32>
    %65 = arith.mulf %64, %1 : vector<2x14x14xf32>
    %c10 = arith.constant 10 : index
    %66 = memref.load %arg1[%c10] : memref<27xf32, #tpu.memory_space<smem>>
    %67 = vector.broadcast %66 : f32 to vector<2x14x14xf32>
    %68 = arith.mulf %67, %2 : vector<2x14x14xf32>
    %69 = arith.addf %65, %68 : vector<2x14x14xf32>
    %c11 = arith.constant 11 : index
    %70 = memref.load %arg1[%c11] : memref<27xf32, #tpu.memory_space<smem>>
    %71 = vector.broadcast %70 : f32 to vector<2x14x14xf32>
    %72 = arith.mulf %71, %3 : vector<2x14x14xf32>
    %73 = arith.addf %69, %72 : vector<2x14x14xf32>
    %c12 = arith.constant 12 : index
    %74 = memref.load %arg1[%c12] : memref<27xf32, #tpu.memory_space<smem>>
    %75 = vector.broadcast %74 : f32 to vector<2x14x14xf32>
    %76 = arith.mulf %75, %4 : vector<2x14x14xf32>
    %77 = arith.addf %73, %76 : vector<2x14x14xf32>
    %c13 = arith.constant 13 : index
    %78 = memref.load %arg1[%c13] : memref<27xf32, #tpu.memory_space<smem>>
    %79 = vector.broadcast %78 : f32 to vector<2x14x14xf32>
    %80 = arith.mulf %79, %5 : vector<2x14x14xf32>
    %81 = arith.addf %77, %80 : vector<2x14x14xf32>
    %c14 = arith.constant 14 : index
    %82 = memref.load %arg1[%c14] : memref<27xf32, #tpu.memory_space<smem>>
    %83 = vector.broadcast %82 : f32 to vector<2x14x14xf32>
    %84 = arith.mulf %83, %6 : vector<2x14x14xf32>
    %85 = arith.addf %81, %84 : vector<2x14x14xf32>
    %c15 = arith.constant 15 : index
    %86 = memref.load %arg1[%c15] : memref<27xf32, #tpu.memory_space<smem>>
    %87 = vector.broadcast %86 : f32 to vector<2x14x14xf32>
    %88 = arith.mulf %87, %7 : vector<2x14x14xf32>
    %89 = arith.addf %85, %88 : vector<2x14x14xf32>
    %c16 = arith.constant 16 : index
    %90 = memref.load %arg1[%c16] : memref<27xf32, #tpu.memory_space<smem>>
    %91 = vector.broadcast %90 : f32 to vector<2x14x14xf32>
    %92 = arith.mulf %91, %8 : vector<2x14x14xf32>
    %93 = arith.addf %89, %92 : vector<2x14x14xf32>
    %c17 = arith.constant 17 : index
    %94 = memref.load %arg1[%c17] : memref<27xf32, #tpu.memory_space<smem>>
    %95 = vector.broadcast %94 : f32 to vector<2x14x14xf32>
    %96 = arith.mulf %95, %9 : vector<2x14x14xf32>
    %97 = arith.addf %93, %96 : vector<2x14x14xf32>
    %c1_10 = arith.constant 1 : index
    %98 = memref.load %arg2[%c1_10] : memref<3xf32, #tpu.memory_space<smem>>
    %99 = vector.broadcast %98 : f32 to vector<2x14x14xf32>
    %100 = arith.addf %97, %99 : vector<2x14x14xf32>
    %c1_11 = arith.constant 1 : index
    %101 = memref.load %arg3[%c1_11] : memref<3xf32, #tpu.memory_space<smem>>
    %102 = vector.broadcast %101 : f32 to vector<2x14x14xf32>
    %103 = arith.mulf %100, %102 : vector<2x14x14xf32>
    %c1_12 = arith.constant 1 : index
    %104 = memref.load %arg4[%c1_12] : memref<3xf32, #tpu.memory_space<smem>>
    %105 = vector.broadcast %104 : f32 to vector<2x14x14xf32>
    %106 = arith.addf %103, %105 : vector<2x14x14xf32>
    %cst_13 = arith.constant 0.000000e+00 : f32
    %107 = vector.broadcast %cst_13 : f32 to vector<2x14x14xf32>
    %108 = arith.maximumf %106, %107 : vector<2x14x14xf32>
    %cst_14 = arith.constant dense<0.000000e+00> : vector<2x14xf32>
    %109 = vector.multi_reduction <add>, %108, %cst_14 [2] : vector<2x14x14xf32> to vector<2x14xf32>
    %cst_15 = arith.constant 1.400000e+01 : f32
    %110 = vector.broadcast %cst_15 : f32 to vector<2x14xf32>
    %111 = arith.divf %109, %110 : vector<2x14xf32>
    %cst_16 = arith.constant dense<0.000000e+00> : vector<2xf32>
    %112 = vector.multi_reduction <add>, %111, %cst_16 [1] : vector<2x14xf32> to vector<2xf32>
    %113 = vector.shape_cast %112 : vector<2xf32> to vector<2x1xf32>
    %cst_17 = arith.constant 1.400000e+01 : f32
    %114 = vector.broadcast %cst_17 : f32 to vector<2x1xf32>
    %115 = arith.divf %113, %114 : vector<2x1xf32>
    %c18 = arith.constant 18 : index
    %116 = memref.load %arg1[%c18] : memref<27xf32, #tpu.memory_space<smem>>
    %117 = vector.broadcast %116 : f32 to vector<2x14x14xf32>
    %118 = arith.mulf %117, %1 : vector<2x14x14xf32>
    %c19 = arith.constant 19 : index
    %119 = memref.load %arg1[%c19] : memref<27xf32, #tpu.memory_space<smem>>
    %120 = vector.broadcast %119 : f32 to vector<2x14x14xf32>
    %121 = arith.mulf %120, %2 : vector<2x14x14xf32>
    %122 = arith.addf %118, %121 : vector<2x14x14xf32>
    %c20 = arith.constant 20 : index
    %123 = memref.load %arg1[%c20] : memref<27xf32, #tpu.memory_space<smem>>
    %124 = vector.broadcast %123 : f32 to vector<2x14x14xf32>
    %125 = arith.mulf %124, %3 : vector<2x14x14xf32>
    %126 = arith.addf %122, %125 : vector<2x14x14xf32>
    %c21 = arith.constant 21 : index
    %127 = memref.load %arg1[%c21] : memref<27xf32, #tpu.memory_space<smem>>
    %128 = vector.broadcast %127 : f32 to vector<2x14x14xf32>
    %129 = arith.mulf %128, %4 : vector<2x14x14xf32>
    %130 = arith.addf %126, %129 : vector<2x14x14xf32>
    %c22 = arith.constant 22 : index
    %131 = memref.load %arg1[%c22] : memref<27xf32, #tpu.memory_space<smem>>
    %132 = vector.broadcast %131 : f32 to vector<2x14x14xf32>
    %133 = arith.mulf %132, %5 : vector<2x14x14xf32>
    %134 = arith.addf %130, %133 : vector<2x14x14xf32>
    %c23 = arith.constant 23 : index
    %135 = memref.load %arg1[%c23] : memref<27xf32, #tpu.memory_space<smem>>
    %136 = vector.broadcast %135 : f32 to vector<2x14x14xf32>
    %137 = arith.mulf %136, %6 : vector<2x14x14xf32>
    %138 = arith.addf %134, %137 : vector<2x14x14xf32>
    %c24 = arith.constant 24 : index
    %139 = memref.load %arg1[%c24] : memref<27xf32, #tpu.memory_space<smem>>
    %140 = vector.broadcast %139 : f32 to vector<2x14x14xf32>
    %141 = arith.mulf %140, %7 : vector<2x14x14xf32>
    %142 = arith.addf %138, %141 : vector<2x14x14xf32>
    %c25 = arith.constant 25 : index
    %143 = memref.load %arg1[%c25] : memref<27xf32, #tpu.memory_space<smem>>
    %144 = vector.broadcast %143 : f32 to vector<2x14x14xf32>
    %145 = arith.mulf %144, %8 : vector<2x14x14xf32>
    %146 = arith.addf %142, %145 : vector<2x14x14xf32>
    %c26 = arith.constant 26 : index
    %147 = memref.load %arg1[%c26] : memref<27xf32, #tpu.memory_space<smem>>
    %148 = vector.broadcast %147 : f32 to vector<2x14x14xf32>
    %149 = arith.mulf %148, %9 : vector<2x14x14xf32>
    %150 = arith.addf %146, %149 : vector<2x14x14xf32>
    %c2_18 = arith.constant 2 : index
    %151 = memref.load %arg2[%c2_18] : memref<3xf32, #tpu.memory_space<smem>>
    %152 = vector.broadcast %151 : f32 to vector<2x14x14xf32>
    %153 = arith.addf %150, %152 : vector<2x14x14xf32>
    %c2_19 = arith.constant 2 : index
    %154 = memref.load %arg3[%c2_19] : memref<3xf32, #tpu.memory_space<smem>>
    %155 = vector.broadcast %154 : f32 to vector<2x14x14xf32>
    %156 = arith.mulf %153, %155 : vector<2x14x14xf32>
    %c2_20 = arith.constant 2 : index
    %157 = memref.load %arg4[%c2_20] : memref<3xf32, #tpu.memory_space<smem>>
    %158 = vector.broadcast %157 : f32 to vector<2x14x14xf32>
    %159 = arith.addf %156, %158 : vector<2x14x14xf32>
    %cst_21 = arith.constant 0.000000e+00 : f32
    %160 = vector.broadcast %cst_21 : f32 to vector<2x14x14xf32>
    %161 = arith.maximumf %159, %160 : vector<2x14x14xf32>
    %cst_22 = arith.constant dense<0.000000e+00> : vector<2x14xf32>
    %162 = vector.multi_reduction <add>, %161, %cst_22 [2] : vector<2x14x14xf32> to vector<2x14xf32>
    %cst_23 = arith.constant 1.400000e+01 : f32
    %163 = vector.broadcast %cst_23 : f32 to vector<2x14xf32>
    %164 = arith.divf %162, %163 : vector<2x14xf32>
    %cst_24 = arith.constant dense<0.000000e+00> : vector<2xf32>
    %165 = vector.multi_reduction <add>, %164, %cst_24 [1] : vector<2x14xf32> to vector<2xf32>
    %166 = vector.shape_cast %165 : vector<2xf32> to vector<2x1xf32>
    %cst_25 = arith.constant 1.400000e+01 : f32
    %167 = vector.broadcast %cst_25 : f32 to vector<2x1xf32>
    %168 = arith.divf %166, %167 : vector<2x1xf32>
    %c0_26 = arith.constant 0 : index
    %c0_27 = arith.constant 0 : index
    %169 = vector.load %arg6[%c0_26, %c0_27] : memref<3x32xf32, #tpu.memory_space<vmem>>, vector<1x32xf32>
    %170 = vector.broadcast %62 : vector<2x1xf32> to vector<2x32xf32>
    %171 = vector.broadcast %169 : vector<1x32xf32> to vector<2x32xf32>
    %172 = arith.mulf %170, %171 : vector<2x32xf32>
    %c1_28 = arith.constant 1 : index
    %c0_29 = arith.constant 0 : index
    %173 = vector.load %arg6[%c1_28, %c0_29] : memref<3x32xf32, #tpu.memory_space<vmem>>, vector<1x32xf32>
    %174 = vector.broadcast %115 : vector<2x1xf32> to vector<2x32xf32>
    %175 = vector.broadcast %173 : vector<1x32xf32> to vector<2x32xf32>
    %176 = arith.mulf %174, %175 : vector<2x32xf32>
    %177 = arith.addf %172, %176 : vector<2x32xf32>
    %c2_30 = arith.constant 2 : index
    %c0_31 = arith.constant 0 : index
    %178 = vector.load %arg6[%c2_30, %c0_31] : memref<3x32xf32, #tpu.memory_space<vmem>>, vector<1x32xf32>
    %179 = vector.broadcast %168 : vector<2x1xf32> to vector<2x32xf32>
    %180 = vector.broadcast %178 : vector<1x32xf32> to vector<2x32xf32>
    %181 = arith.mulf %179, %180 : vector<2x32xf32>
    %182 = arith.addf %177, %181 : vector<2x32xf32>
    %c0_32 = arith.constant 0 : index
    %c0_33 = arith.constant 0 : index
    %183 = vector.load %arg7[%c0_32, %c0_33] : memref<1x32xf32, #tpu.memory_space<vmem>>, vector<1x32xf32>
    %184 = vector.broadcast %183 : vector<1x32xf32> to vector<2x32xf32>
    %185 = arith.addf %182, %184 : vector<2x32xf32>
    %c0_34 = arith.constant 0 : index
    %c0_35 = arith.constant 0 : index
    %186 = vector.load %arg8[%c0_34, %c0_35] : memref<32x32xf32, #tpu.memory_space<vmem>>, vector<32x32xf32>
    %cst_36 = arith.constant dense<0.000000e+00> : vector<2x32xf32>
    %187 = tpu.matmul %185, %186, %cst_36 {dimension_numbers = #tpu.dot_dimension_numbers<[1], [0], [0], [1], [0, 0, 1, 1], [], []>} : vector<2x32xf32>, vector<32x32xf32>, vector<2x32xf32> -> vector<2x32xf32>
    %c0_37 = arith.constant 0 : index
    %c0_38 = arith.constant 0 : index
    %188 = vector.load %arg9[%c0_37, %c0_38] : memref<1x32xf32, #tpu.memory_space<vmem>>, vector<1x32xf32>
    %189 = vector.broadcast %188 : vector<1x32xf32> to vector<2x32xf32>
    %190 = arith.addf %187, %189 : vector<2x32xf32>
    %c0_39 = arith.constant 0 : index
    %c0_40 = arith.constant 0 : index
    %191 = vector.load %arg10[%c0_39, %c0_40] : memref<32x32xf32, #tpu.memory_space<vmem>>, vector<32x32xf32>
    %cst_41 = arith.constant dense<0.000000e+00> : vector<2x32xf32>
    %192 = tpu.matmul %190, %191, %cst_41 {dimension_numbers = #tpu.dot_dimension_numbers<[1], [0], [0], [1], [0, 0, 1, 1], [], []>} : vector<2x32xf32>, vector<32x32xf32>, vector<2x32xf32> -> vector<2x32xf32>
    %c0_42 = arith.constant 0 : index
    %c0_43 = arith.constant 0 : index
    %193 = vector.load %arg11[%c0_42, %c0_43] : memref<1x32xf32, #tpu.memory_space<vmem>>, vector<1x32xf32>
    %194 = vector.broadcast %193 : vector<1x32xf32> to vector<2x32xf32>
    %195 = arith.addf %192, %194 : vector<2x32xf32>
    %cst_44 = arith.constant 5.000000e-01 : f32
    %196 = vector.broadcast %cst_44 : f32 to vector<2x32xf32>
    %197 = arith.mulf %196, %195 : vector<2x32xf32>
    %cst_45 = arith.constant 4.471500e-02 : f32
    %198 = vector.broadcast %cst_45 : f32 to vector<2x32xf32>
    %199 = arith.mulf %198, %195 : vector<2x32xf32>
    %200 = arith.mulf %199, %195 : vector<2x32xf32>
    %201 = arith.mulf %200, %195 : vector<2x32xf32>
    %202 = arith.addf %195, %201 : vector<2x32xf32>
    %cst_46 = arith.constant 0.797884583 : f32
    %203 = vector.broadcast %cst_46 : f32 to vector<2x32xf32>
    %204 = arith.mulf %203, %202 : vector<2x32xf32>
    %205 = math.tanh %204 : vector<2x32xf32>
    %cst_47 = arith.constant 1.000000e+00 : f32
    %206 = vector.broadcast %cst_47 : f32 to vector<2x32xf32>
    %207 = arith.addf %206, %205 : vector<2x32xf32>
    %208 = arith.mulf %197, %207 : vector<2x32xf32>
    %c0_48 = arith.constant 0 : index
    %c0_49 = arith.constant 0 : index
    %209 = vector.load %arg12[%c0_48, %c0_49] : memref<1x32xf32, #tpu.memory_space<vmem>>, vector<1x32xf32>
    %210 = vector.broadcast %209 : vector<1x32xf32> to vector<2x32xf32>
    %211 = arith.mulf %208, %210 : vector<2x32xf32>
    %c0_50 = arith.constant 0 : index
    %c0_51 = arith.constant 0 : index
    %212 = vector.load %arg13[%c0_50, %c0_51] : memref<1x32xf32, #tpu.memory_space<vmem>>, vector<1x32xf32>
    %213 = vector.broadcast %212 : vector<1x32xf32> to vector<2x32xf32>
    %214 = arith.addf %211, %213 : vector<2x32xf32>
    %c0_52 = arith.constant 0 : index
    %c0_53 = arith.constant 0 : index
    %215 = vector.load %arg14[%c0_52, %c0_53] : memref<32x8xf32, #tpu.memory_space<vmem>>, vector<32x8xf32>
    %cst_54 = arith.constant dense<0.000000e+00> : vector<2x8xf32>
    %216 = tpu.matmul %214, %215, %cst_54 {dimension_numbers = #tpu.dot_dimension_numbers<[1], [0], [0], [1], [0, 0, 1, 1], [], []>} : vector<2x32xf32>, vector<32x8xf32>, vector<2x8xf32> -> vector<2x8xf32>
    %c0_55 = arith.constant 0 : index
    %c0_56 = arith.constant 0 : index
    %217 = vector.load %arg15[%c0_55, %c0_56] : memref<1x8xf32, #tpu.memory_space<vmem>>, vector<1x8xf32>
    %218 = vector.broadcast %217 : vector<1x8xf32> to vector<2x8xf32>
    %219 = arith.addf %216, %218 : vector<2x8xf32>
    %c0_57 = arith.constant 0 : index
    %c0_58 = arith.constant 0 : index
    %220 = vector.load %arg16[%c0_57, %c0_58] : memref<2x8xf32, #tpu.memory_space<vmem>>, vector<2x8xf32>
    tpu.vector_store %arg16[%c0_57, %c0_58], %219 {strides = array<i32>} : memref<2x8xf32, #tpu.memory_space<vmem>>, vector<2x8xf32>,
    return
  }
  func.func @transform_0(%arg0: i32) -> i32 {
    %c0_i32 = arith.constant 0 : i32
    %c0_i32_0 = arith.constant 0 : i32
    return %c0_i32 : i32
  }
  func.func @transform_1(%arg0: i32) -> i32 {
    %c0_i32 = arith.constant 0 : i32
    %c0_i32_0 = arith.constant 0 : i32
    return %c0_i32 : i32
  }
  func.func @transform_2(%arg0: i32) -> i32 {
    %c0_i32 = arith.constant 0 : i32
    %c0_i32_0 = arith.constant 0 : i32
    return %c0_i32 : i32
  }
  func.func @transform_3(%arg0: i32) -> i32 {
    %c0_i32 = arith.constant 0 : i32
    %c0_i32_0 = arith.constant 0 : i32
    return %c0_i32 : i32
  }
  func.func @transform_4(%arg0: i32) -> (i32, i32, i32) {
    %c0_i32 = arith.constant 0 : i32
    %c0_i32_0 = arith.constant 0 : i32
    %c0_i32_1 = arith.constant 0 : i32
    return %arg0, %c0_i32, %c0_i32_0 : i32, i32, i32
  }
  func.func @transform_5(%arg0: i32) -> (i32, i32) {
    %c0_i32 = arith.constant 0 : i32
    %c0_i32_0 = arith.constant 0 : i32
    %c0_i32_1 = arith.constant 0 : i32
    return %c0_i32, %c0_i32_0 : i32, i32
  }
  func.func @transform_6(%arg0: i32) -> (i32, i32) {
    %c0_i32 = arith.constant 0 : i32
    %c0_i32_0 = arith.constant 0 : i32
    %c0_i32_1 = arith.constant 0 : i32
    return %c0_i32, %c0_i32_0 : i32, i32
  }
  func.func @transform_7(%arg0: i32) -> (i32, i32) {
    %c0_i32 = arith.constant 0 : i32
    %c0_i32_0 = arith.constant 0 : i32
    %c0_i32_1 = arith.constant 0 : i32
    return %c0_i32, %c0_i32_0 : i32, i32
  }
  func.func @transform_8(%arg0: i32) -> (i32, i32) {
    %c0_i32 = arith.constant 0 : i32
    %c0_i32_0 = arith.constant 0 : i32
    %c0_i32_1 = arith.constant 0 : i32
    return %c0_i32, %c0_i32_0 : i32, i32
  }
  func.func @transform_9(%arg0: i32) -> (i32, i32) {
    %c0_i32 = arith.constant 0 : i32
    %c0_i32_0 = arith.constant 0 : i32
    %c0_i32_1 = arith.constant 0 : i32
    return %c0_i32, %c0_i32_0 : i32, i32
  }
  func.func @transform_10(%arg0: i32) -> (i32, i32) {
    %c0_i32 = arith.constant 0 : i32
    %c0_i32_0 = arith.constant 0 : i32
    %c0_i32_1 = arith.constant 0 : i32
    return %c0_i32, %c0_i32_0 : i32, i32
  }
  func.func @transform_11(%arg0: i32) -> (i32, i32) {
    %c0_i32 = arith.constant 0 : i32
    %c0_i32_0 = arith.constant 0 : i32
    %c0_i32_1 = arith.constant 0 : i32
    return %c0_i32, %c0_i32_0 : i32, i32
  }
  func.func @transform_12(%arg0: i32) -> (i32, i32) {
    %c0_i32 = arith.constant 0 : i32
    %c0_i32_0 = arith.constant 0 : i32
    %c0_i32_1 = arith.constant 0 : i32
    return %c0_i32, %c0_i32_0 : i32, i32
  }
  func.func @transform_13(%arg0: i32) -> (i32, i32) {
    %c0_i32 = arith.constant 0 : i32
    %c0_i32_0 = arith.constant 0 : i32
    %c0_i32_1 = arith.constant 0 : i32
    return %c0_i32, %c0_i32_0 : i32, i32
  }
  func.func @transform_14(%arg0: i32) -> (i32, i32) {
    %c0_i32 = arith.constant 0 : i32
    %c0_i32_0 = arith.constant 0 : i32
    %c0_i32_1 = arith.constant 0 : i32
    return %c0_i32, %c0_i32_0 : i32, i32
  }
  func.func @transform_15(%arg0: i32) -> (i32, i32) {
    %c0_i32 = arith.constant 0 : i32
    %c0_i32_0 = arith.constant 0 : i32
    return %arg0, %c0_i32 : i32, i32
  }
}

</mosaic_0001>

<bundles_post_ra>
// kernel: tpu_custom_call.1
= control target key start
LH: loop header
LB: loop body
LE: loop exit
PB: predicated region body
PF: predicated region fallthrough
CT: control target
= control target key end

     0   :  { %20 = vsyncpa [#allocation6], 0  ;;  %s2367_s0 = inlined_call_operand.vmem [shape: f32[27], index: 0, kind: input, shape index: {}]   ;;  %s2368_s1 = inlined_call_operand.vmem [shape: f32[3], index: 1, kind: input, shape index: {}]   ;;  %s2369_s2 = inlined_call_operand.hbm [shape: f32[3], index: 2, kind: input, shape index: {}]   ;;  %s2370_s3 = inlined_call_operand.hbm [shape: f32[3], index: 3, kind: input, shape index: {}]   ;;  %s2371_s4 = inlined_call_operand.vmem [shape: f32[2,16,16], index: 4, kind: input, shape index: {}]   ;;  %s2372_s5 = inlined_call_operand.hbm [shape: f32[3,32], index: 5, kind: input, shape index: {}]   ;;  %s2373_s6 = inlined_call_operand.hbm [shape: f32[1,32], index: 6, kind: input, shape index: {}]   ;;  %s2374_s7 = inlined_call_operand.vmem [shape: f32[32,32], index: 7, kind: input, shape index: {}]   ;;  %s2375_s8 = inlined_call_operand.hbm [shape: f32[1,32], index: 8, kind: input, shape index: {}]   ;;  %s2376_s9 = inlined_call_operand.hbm [shape: f32[32,32], index: 9, kind: input, shape index: {}]   ;;  %s2377_s10 = inlined_call_operand.vmem [shape: f32[1,32], index: 10, kind: input, shape index: {}]   ;;  %s2378_s11 = inlined_call_operand.vmem [shape: f32[1,32], index: 11, kind: input, shape index: {}]   ;;  %s2379_s12 = inlined_call_operand.vmem [shape: f32[1,32], index: 12, kind: input, shape index: {}]   ;;  %s2380_s13 = inlined_call_operand.vmem [shape: f32[32,8], index: 13, kind: input, shape index: {}]   ;;  %s2381_s14 = inlined_call_operand.vmem [shape: f32[1,8], index: 14, kind: input, shape index: {}]   ;;  %s2382_s15 = inlined_call_operand.hbm [shape: f32[2,8], index: 15, kind: output, shape index: {}]  }
   0x1   :  { %21 = vsyncpa [#allocation8], 0 }
   0x2   :  { %22 = vsyncpa [#allocation5], 0 }
   0x3   :  { %23 = vsyncpa [#allocation11], 0 }
   0x4   :  { %24 = vsyncpa [#allocation3], 0 }
   0x5   :  { %25 = vsyncpa [#allocation14], 0 }
   0x6   :  { %26 = vsyncpa [#allocation17], 0 }
   0x7   :  { %27 = vsyncpa [#allocation4], 0  ;;  %s34_s20 = sshll.u32 %s2367_s0, 4  ;;  %s1687_s21 = smov [#allocation13]   ;;  %s35_s20 = int_to_ptr.vmem [resolvable:$true] %s34_s20 }
   0x8   :  { %s82_s22 = sshll.u32 %s1687_s21, 4  ;;  %s1517_s25 = scalar_lea.hbm %s2373_s6, 16  ;;  %s83_s22 = int_to_ptr.vmem [resolvable:$true] %s82_s22 }
   0x9   :  { %p1518_p0 = scmp.ne.s32.totalorder %s2373_s6, %s1517_s25  ;;  %p1521_p1 = scmp.lt.u32.totalorder %s1517_s25, %s2373_s6 }
   0xb   :  { %p1523_p2 = pnand %p1521_p1, %p1518_p0 }
   0xd   :  { %1526 = shalt.err (!%p1523_p2)
}
   0xe   :  { %s1527_s30 = scalar_lea.vmem %s83_s22, 16  ;;  %s1531_s0 = scalar_lea.vmem %s83_s22, 32 }
   0xf   :  { %p1528_p3 = scmp.ne.s32.totalorder %s83_s22, %s1527_s30  ;;  %p1532_p4 = scmp.lt.s32.totalorder %s83_s22, %s83_s22 }
  0x10   :  { %p1533_p5 = scmp.lt.s32.totalorder %s1531_s0, %s1527_s30 }
  0x12   :  { %p1534_p6 = por %p1533_p5, %p1532_p4 }
  0x14   :  { %p1535_p7 = pnand %p1534_p6, %p1528_p3 }
  0x16   :  { %1538 = shalt.err (!%p1535_p7)
}
  0x17   :  { %85 = dma.hbm_to_vmem [thread:$0]  %s2373_s6, 16, %s83_s22, [#allocation14]  }
  0x18   :  { %s1539_s18 = scalar_lea.vmem %s35_s20, 16  ;;  %p1544_p9 = scmp.lt.s32.totalorder %s35_s20, %s35_s20 }
  0x19   :  { %p1540_p8 = scmp.ne.s32.totalorder %s35_s20, %s1539_s18  ;;  %p1545_p10 = scmp.lt.s32.totalorder %s1539_s18, %s1539_s18 }
  0x1b   :  { %p1546_p11 = por %p1545_p10, %p1544_p9 }
  0x1d   :  { %p1547_p12 = pnand %p1546_p11, %p1540_p8 }
  0x1f   :  { %1550 = shalt.err (!%p1547_p12)
}
  0x20   :  { %s1688_s19 = smov [#allocation2]   ;;  %s44_s24 = sshll.u32 %s2368_s1, 4  ;;  %s45_s24 = int_to_ptr.vmem [resolvable:$true] %s44_s24 }
  0x21   :  { %37 = dma.vmem_to_smem %s35_s20, 16, %s1688_s19, [#allocation6]  }
  0x22   :  { %s1551_s25 = scalar_lea.vmem %s45_s24, 16  ;;  %p1556_p0 = scmp.lt.s32.totalorder %s45_s24, %s45_s24 }
  0x23   :  { %p1552_p13 = scmp.ne.s32.totalorder %s45_s24, %s1551_s25  ;;  %p1557_p1 = scmp.lt.s32.totalorder %s1551_s25, %s1551_s25 }
  0x25   :  { %p1558_p2 = por %p1557_p1, %p1556_p0 }
  0x27   :  { %p1559_p3 = pnand %p1558_p2, %p1552_p13 }
  0x29   :  { %1562 = shalt.err (!%p1559_p3)
}
  0x2a   :  { %s1689_s6 = smov [#allocation7]   ;;  %s1563_s27 = scalar_lea.hbm %s2369_s2, 16 }
  0x2b   :  { %47 = dma.vmem_to_smem %s45_s24, 16, %s1689_s6, [#allocation8]  }
  0x2c   :  { %p1564_p4 = scmp.ne.s32.totalorder %s2369_s2, %s1563_s27  ;;  %p1567_p5 = scmp.lt.u32.totalorder %s1563_s27, %s2369_s2 }
  0x2e   :  { %p1569_p6 = pnand %p1567_p5, %p1564_p4 }
  0x30   :  { %1572 = shalt.err (!%p1569_p6)
}
  0x31   :  { %s1690_s30 = smov [#allocation9]   ;;  %s1573_s19 = scalar_lea.hbm %s2370_s3, 16 }
  0x32   :  { %55 = dma.hbm_to_smem %s2369_s2, 16, %s1690_s30, [#allocation5]  }
  0x33   :  { %p1574_p7 = scmp.ne.s32.totalorder %s2370_s3, %s1573_s19  ;;  %p1577_p8 = scmp.lt.u32.totalorder %s1573_s19, %s2370_s3 }
  0x35   :  { %p1579_p9 = pnand %p1577_p8, %p1574_p7 }
  0x37   :  { %1582 = shalt.err (!%p1579_p9)
}
  0x38   :  { %s1691_s6 = smov [#allocation10]   ;;  %s1692_s2 = smov [#allocation12]  }
  0x39   :  { %63 = dma.hbm_to_smem %s2370_s3, 16, %s1691_s6, [#allocation11]  }
  0x3a   :  { %s72_s27 = sshll.u32 %s1692_s2, 4  ;;  %s1693_s28 = smov [#allocation15]   ;;  %s73_s27 = int_to_ptr.vmem [resolvable:$true] %s72_s27 }
  0x3b   :  { %s94_s20 = sshll.u32 %s1693_s28, 4  ;;  %s1583_s30 = scalar_lea.hbm %s2372_s5, 64  ;;  %s95_s20 = int_to_ptr.vmem [resolvable:$true] %s94_s20 }
  0x3c   :  { %p1584_p10 = scmp.ne.s32.totalorder %s2372_s5, %s1583_s30  ;;  %p1587_p11 = scmp.lt.u32.totalorder %s1583_s30, %s2372_s5 }
  0x3e   :  { %p1589_p12 = pnand %p1587_p11, %p1584_p10 }
  0x40   :  { %1592 = shalt.err (!%p1589_p12)
}
  0x41   :  { %s1593_s3 = scalar_lea.vmem %s73_s27, 64  ;;  %p1598_p0 = scmp.lt.s32.totalorder %s73_s27, %s73_s27 }
  0x42   :  { %p1594_p13 = scmp.ne.s32.totalorder %s73_s27, %s1593_s3  ;;  %p1599_p1 = scmp.lt.s32.totalorder %s1593_s3, %s1593_s3 }
  0x44   :  { %p1600_p2 = por %p1599_p1, %p1598_p0 }
  0x46   :  { %p1601_p3 = pnand %p1600_p2, %p1594_p13 }
  0x48   :  { %1604 = shalt.err (!%p1601_p3)
}
  0x49   :  { %75 = dma.hbm_to_vmem [thread:$0]  %s2372_s5, 64, %s73_s27, [#allocation3]  }
  0x4a   :  { %s1605_s25 = scalar_lea.hbm %s2375_s8, 16 }
  0x4b   :  { %p1606_p4 = scmp.ne.s32.totalorder %s2375_s8, %s1605_s25  ;;  %p1609_p5 = scmp.lt.u32.totalorder %s1605_s25, %s2375_s8 }
  0x4d   :  { %p1611_p6 = pnand %p1609_p5, %p1606_p4 }
  0x4f   :  { %1614 = shalt.err (!%p1611_p6)
}
  0x50   :  { %s1615_s28 = scalar_lea.vmem %s95_s20, 16  ;;  %s1619_s29 = scalar_lea.vmem %s95_s20, 32 }
  0x51   :  { %p1616_p7 = scmp.ne.s32.totalorder %s95_s20, %s1615_s28  ;;  %p1620_p8 = scmp.lt.s32.totalorder %s95_s20, %s95_s20 }
  0x52   :  { %p1621_p9 = scmp.lt.s32.totalorder %s1619_s29, %s1615_s28 }
  0x54   :  { %p1622_p10 = por %p1621_p9, %p1620_p8 }
  0x56   :  { %p1623_p11 = pnand %p1622_p10, %p1616_p7 }
  0x58   :  { %1626 = shalt.err (!%p1623_p11)
}
  0x59   :  { %97 = dma.hbm_to_vmem [thread:$0]  %s2375_s8, 16, %s95_s20, [#allocation14]  }
  0x5a   :  { %s1694_s1 = smov [#allocation16]   ;;  %s1627_s17 = scalar_lea.hbm %s2376_s9, 512 }
  0x5b   :  { %s103_s30 = sshll.u32 %s1694_s1, 4  ;;  %p1628_p12 = scmp.ne.s32.totalorder %s2376_s9, %s1627_s17  ;;  %s104_s30 = int_to_ptr.vmem [resolvable:$true] %s103_s30 }
  0x5c   :  { %p1631_p13 = scmp.lt.u32.totalorder %s1627_s17, %s2376_s9 }
  0x5e   :  { %p1633_p0 = pnand %p1631_p13, %p1628_p12 }
  0x60   :  { %1636 = shalt.err (!%p1633_p0)
}
  0x61   :  { %s1637_s23 = scalar_lea.vmem %s104_s30, 512  ;;  %p1642_p2 = scmp.lt.s32.totalorder %s104_s30, %s104_s30 }
  0x62   :  { %p1638_p1 = scmp.ne.s32.totalorder %s104_s30, %s1637_s23  ;;  %p1643_p3 = scmp.lt.s32.totalorder %s1637_s23, %s1637_s23 }
  0x64   :  { %p1644_p4 = por %p1643_p3, %p1642_p2 }
  0x66   :  { %p1645_p5 = pnand %p1644_p4, %p1638_p1 }
  0x68   :  { %1648 = shalt.err (!%p1645_p5)
}
  0x69   :  { %s1695_s8 = smov 128   ;;  %s1696_s20 = smov 8  }
  0x6a   :  { %109 = dma.hbm_to_vmem [thread:$0]  %s2376_s9, 512, %s104_s30, [#allocation17], %s1695_s8, %s1695_s8, %s1696_s20  }
  0x6b   :  { %1671 = dma.done.wait [#allocation6], 16  }
  0x6c   :  { %1672 = vsyncadd [#allocation6], 4294967280 }
  0x6d   :  { %1673 = dma.done.wait [#allocation8], 16  }
  0x6e   :  { %1674 = vsyncadd [#allocation8], 4294967280 }
  0x6f   :  { %1675 = dma.done.wait [#allocation5], 16  }
  0x70   :  { %1676 = vsyncadd [#allocation5], 4294967280 }
  0x71   :  { %1677 = dma.done.wait [#allocation11], 16  }
  0x72   :  { %1678 = vsyncadd [#allocation11], 4294967280 }
  0x73   :  { %1679 = dma.done.wait [#allocation3], 64  }
  0x74   :  { %1680 = vsyncadd [#allocation3], 4294967232 }
  0x75   :  { %1681 = dma.done.wait [#allocation14], 32  }
  0x76   :  { %1682 = vsyncadd [#allocation14], 4294967264 }
  0x77   :  { %1683 = dma.done.wait [#allocation17], 512  }
  0x78   :  { %1684 = vsyncadd [#allocation17], 4294966784 }
  0x79   :  { %144 = sfence }
  0x7a   :  { %s1389_s6 = sld [smem:[#allocation2 + $0x1]]  ;;  %s1398_s22 = sld [smem:[#allocation2 + $0xa]]  ;;  %v1864_v0 = vld [vmem:[%s2371_s4 + $0x10] sm:$0xff]  ;;  %v1869_v1 = vld [vmem:[%s2371_s4] sm:$0xff]  ;;  %v1874_v3 = vld [vmem:[%s2371_s4 + $0x18] sm:$0xff]  ;;  %vm217_vm0 = vcmask 1046528  }
  0x7b   :  { %v1879_v4 = vld [vmem:[%s2371_s4 + $0x8] sm:$0xff]  ;;  %s1697_s30 = smov 127   ;;  %s1390_s0 = sld [smem:[#allocation2 + $0x2]]  ;;  %vm306_vm1 = vcmask 1045504   ;;  %vm411_vm2 = vcmask 111616   ;;  %vm407_vm3 = vcmask 113664  }
  0x7c   :  { %s1399_s4 = sld [smem:[#allocation2 + $0xb]]  ;;  %s1698_s16 = smov 126   ;;  %vm441_vm4 = vcmask 130112   ;;  %vm452_vm5 = vcmask 1041409   ;;  %vm455_vm6 = vcmask 107520   ;;  %vm1700_vm7 = vmmov 0  }
  0x7d   :  { %s1410_s17 = sld [smem:[#allocation2 + $0x13]]  ;;  %s1411_s18 = sld [smem:[#allocation2 + $0x14]]  ;;  %vm1099_vm8 = vcmask 261120   ;;  %vm1366_vm9 = vcmask 58368  }
  0x7e   :  { %s1392_s3 = sld [smem:[#allocation2 + $0x4]]  ;;  %s1401_s19 = sld [smem:[#allocation2 + $0xd]] }
  0x7f   :  { %s1393_s21 = sld [smem:[#allocation2 + $0x5]]  ;;  %s1402_s23 = sld [smem:[#allocation2 + $0xe]] }
  0x80   :  { %v156_v2 = vstv %s1389_s6  ;;  %v467_v9 = vstv %s1398_s22  ;;  %s1413_s8 = sld [smem:[#allocation2 + $0x16]]  ;;  %s1414_s20 = sld [smem:[#allocation2 + $0x17]] }
  0x81   :  { %v159_v5 = vmul.f32 %v156_v2, %v1864_v0  ;;  %v157_v6 = vmul.f32 %v156_v2, %v1869_v1  ;;  %v160_v7 = vmul.f32 %v156_v2, %v1874_v3  ;;  %v158_v8 = vmul.f32 %v156_v2, %v1879_v4  ;;  %s1395_s24 = sld [smem:[#allocation2 + $0x7]]  ;;  %s1404_s25 = sld [smem:[#allocation2 + $0x10]] }
  0x82   :  { %v469_v10 = vmul.f32 %v467_v9, %v1879_v4  ;;  %v468_v11 = vmul.f32 %v467_v9, %v1869_v1  ;;  %v471_v12 = vmul.f32 %v467_v9, %v1874_v3  ;;  %v470_v13 = vmul.f32 %v467_v9, %v1864_v0  ;;  %s1396_s6 = sld [smem:[#allocation2 + $0x8]]  ;;  %s1405_s22 = sld [smem:[#allocation2 + $0x11]] }
  0x83   :  { %169 = vrot.lane.b32.xlu1 %v159_v5, %s1697_s30  ;;  %165 = vrot.lane.b32.xlu0 %v157_v6, %s1697_s30  ;;  %v182_v14 = vstv %s1390_s0  ;;  %v493_v19 = vstv %s1399_s4  ;;  %s1416_s26 = sld [smem:[#allocation2 + $0x19]]  ;;  %s1391_s2 = sld [smem:[#allocation2 + $0x3]] }
  0x84   :  { %v184_v15 = vmul.f32 %v182_v14, %v1879_v4  ;;  %v183_v16 = vmul.f32 %v182_v14, %v1869_v1  ;;  %v186_v17 = vmul.f32 %v182_v14, %v1874_v3  ;;  %v185_v18 = vmul.f32 %v182_v14, %v1864_v0  ;;  %s149_s9 = sld [smem:[#allocation2]]  ;;  %s1417_s28 = sld [smem:[#allocation2 + $0x1a]] }
  0x85   :  { %v495_v20 = vmul.f32 %v493_v19, %v1879_v4  ;;  %v494_v21 = vmul.f32 %v493_v19, %v1869_v1  ;;  %v497_v22 = vmul.f32 %v493_v19, %v1874_v3  ;;  %v496_v23 = vmul.f32 %v493_v19, %v1864_v0  ;;  %s1400_s29 = sld [smem:[#allocation2 + $0xc]]  ;;  %s2028_s5 = sld [smem:[#allocation2 + $0x9]] }
  0x86   :  { %v767_v24 = vstv %s1410_s17  ;;  %v793_v29 = vstv %s1411_s18  ;;  %v233_v30 = vstv %s1392_s3  ;;  %v543_v41 = vstv %s1401_s19  ;;  %s1412_s27 = sld [smem:[#allocation2 + $0x15]]  ;;  %s1409_s1 = sld [smem:[#allocation2 + $0x12]] }
  0x87   :  { %171 = vrot.lane.b32.xlu1 %v160_v7, %s1697_s30  ;;  %167 = vrot.lane.b32.xlu0 %v158_v8, %s1697_s30  ;;  %v769_v25 = vmul.f32 %v767_v24, %v1879_v4  ;;  %v768_v26 = vmul.f32 %v767_v24, %v1869_v1  ;;  %v771_v27 = vmul.f32 %v767_v24, %v1874_v3  ;;  %v265_v48 = vstv %s1393_s21  ;;  %s1403_s0 = sld [smem:[#allocation2 + $0xf]]  ;;  %s1415_s4 = sld [smem:[#allocation2 + $0x18]] }
  0x88   :  { %v770_v28 = vmul.f32 %v767_v24, %v1864_v0  ;;  %v795_v31 = vmul.f32 %v793_v29, %v1879_v4  ;;  %v794_v32 = vmul.f32 %v793_v29, %v1869_v1  ;;  %v235_v33 = vmul.f32 %v233_v30, %v1879_v4  ;;  %s391_s17 = sld [smem:[#allocation9]]  ;;  %s1406_s3 = sld [smem:[#allocation7 + $0x1]] }
  0x89   :  { %v234_v34 = vmul.f32 %v233_v30, %v1869_v1  ;;  %v797_v35 = vmul.f32 %v793_v29, %v1874_v3  ;;  %v796_v36 = vmul.f32 %v793_v29, %v1864_v0  ;;  %v237_v37 = vmul.f32 %v233_v30, %v1874_v3  ;;  %s397_s18 = sld [smem:[#allocation10]]  ;;  %s1407_s19 = sld [smem:[#allocation9 + $0x1]] }
  0x8a   :  { %v243_v38 = vrot.slane %v235_v33, 1  ;;  %v236_v40 = vmul.f32 %v233_v30, %v1864_v0  ;;  %v545_v45 = vmul.f32 %v543_v41, %v1879_v4  ;;  %v544_v46 = vmul.f32 %v543_v41, %v1869_v1  ;;  %s2262_s21 = sld [smem:[#allocation10 + $0x1]] }
  0x8b   :  { %478 = vrot.lane.b32.xlu1 %v469_v10, %s1697_s30  ;;  %476 = vrot.lane.b32.xlu0 %v468_v11, %s1697_s30  ;;  %v242_v39 = vrot.slane %v234_v34, 1  ;;  %v246_v42 = vrot.slane %v237_v37, 1  ;;  %v547_v47 = vmul.f32 %v543_v41, %v1874_v3  ;;  %v546_v52 = vmul.f32 %v543_v41, %v1864_v0 }
  0x8c   :  { %v245_v44 = vrot.slane %v236_v40, 1  ;;  %v553_v50 = vrot.slane %v545_v45, 1  ;;  %v552_v51 = vrot.slane %v544_v46, 1  ;;  %v267_v53 = vmul.f32 %v265_v48, %v1879_v4 }
  0x8d   :  { %v244_v43 = vsel %vm217_vm0, %v242_v39, %v243_v38  ;;  %v556_v55 = vrot.slane %v547_v47, 1  ;;  %v555_v56 = vrot.slane %v546_v52, 1  ;;  %v266_v57 = vmul.f32 %v265_v48, %v1869_v1 }
  0x8e   :  { %v247_v49 = vsel %vm217_vm0, %v245_v44, %v246_v42  ;;  %v554_v54 = vsel %vm217_vm0, %v552_v51, %v553_v50  ;;  %v275_v58 = vrot.slane %v267_v53, 1  ;;  %v575_v59 = vstv %s1402_s23  ;;  %s1418_s23 = sld [smem:[#allocation7 + $0x2]] }
  0x8f   :  { %482 = vrot.lane.b32.xlu1 %v471_v12, %s1697_s30  ;;  %480 = vrot.lane.b32.xlu0 %v470_v13, %s1697_s30  ;;  %v557_v60 = vsel %vm217_vm0, %v555_v56, %v556_v55  ;;  %v274_v61 = vrot.slane %v266_v57, 1  ;;  %v269_v62 = vmul.f32 %v265_v48, %v1874_v3  ;;  %v268_v63 = vmul.f32 %v265_v48, %v1864_v0 }
  0x90   :  { %v577_v2 = vmul.f32 %v575_v59, %v1879_v4  ;;  %v576_v8 = vmul.f32 %v575_v59, %v1869_v1  ;;  %v579_v9 = vmul.f32 %v575_v59, %v1874_v3  ;;  %v843_v10 = vstv %s1413_s8  ;;  %s1419_s8 = sld [smem:[#allocation9 + $0x2]] }
  0x91   :  { %v276_v5 = vsel %vm217_vm0, %v274_v61, %v275_v58  ;;  %v278_v6 = vrot.slane %v269_v62, 1  ;;  %v277_v7 = vrot.slane %v268_v63, 1  ;;  %v578_v14 = vmul.f32 %v575_v59, %v1864_v0 }
  0x92   :  { %v585_v12 = vrot.slane %v577_v2, 1  ;;  %v584_v13 = vrot.slane %v576_v8, 1  ;;  %v844_v19 = vmul.f32 %v843_v10, %v1869_v1  ;;  %v846_v24 = vmul.f32 %v843_v10, %v1864_v0 }
  0x93   :  { %193 = vrot.lane.b32.xlu1 %v184_v15, %s1698_s16  ;;  %191 = vrot.lane.b32.xlu0 %v183_v16, %s1698_s16  ;;  %v279_v11 = vsel %vm217_vm0, %v277_v7, %v278_v6  ;;  %v845_v15 = vmul.f32 %v843_v10, %v1879_v4 }
  0x94   :  { %v586_v16 = vsel %vm217_vm0, %v584_v13, %v585_v12 }
  0x97   :  { %197 = vrot.lane.b32.xlu1 %v186_v17, %s1698_s16  ;;  %195 = vrot.lane.b32.xlu0 %v185_v18, %s1698_s16  ;;  %v588_v17 = vrot.slane %v579_v9, 1  ;;  %v587_v18 = vrot.slane %v578_v14, 1 }
  0x9b   :  { %504 = vrot.lane.b32.xlu1 %v495_v20, %s1698_s16  ;;  %502 = vrot.lane.b32.xlu0 %v494_v21, %s1698_s16  ;;  %v847_v20 = vmul.f32 %v843_v10, %v1874_v3  ;;  %v589_v21 = vsel %vm217_vm0, %v587_v18, %v588_v17 }
  0x9f   :  { %508 = vrot.lane.b32.xlu1 %v497_v22, %s1698_s16  ;;  %506 = vrot.lane.b32.xlu0 %v496_v23, %s1698_s16  ;;  %v853_v22 = vrot.slane %v845_v15, 1  ;;  %v852_v23 = vrot.slane %v844_v19, 1 }
  0xa3   :  { %778 = vrot.lane.b32.xlu1 %v769_v25, %s1697_s30  ;;  %776 = vrot.lane.b32.xlu0 %v768_v26, %s1697_s30  ;;  %v875_v25 = vstv %s1414_s20  ;;  %v856_v26 = vrot.slane %v847_v20, 1  ;;  %s1420_s20 = sld [smem:[#allocation10 + $0x2]] }
  0xa4   :  { %v877_v29 = vmul.f32 %v875_v25, %v1879_v4  ;;  %v876_v30 = vmul.f32 %v875_v25, %v1869_v1 }
  0xa6   :  { %v885_v34 = vrot.slane %v877_v29, 1 }
  0xa7   :  { %782 = vrot.lane.b32.xlu1 %v771_v27, %s1697_s30  ;;  %780 = vrot.lane.b32.xlu0 %v770_v28, %s1697_s30  ;;  %v854_v27 = vsel %vm217_vm0, %v852_v23, %v853_v22  ;;  %v855_v28 = vrot.slane %v846_v24, 1 }
  0xa9   :  { %v857_v33 = vsel %vm217_vm0, %v855_v28, %v856_v26 }
  0xab   :  { %804 = vrot.lane.b32.xlu1 %v795_v31, %s1698_s16  ;;  %802 = vrot.lane.b32.xlu0 %v794_v32, %s1698_s16  ;;  %v879_v31 = vmul.f32 %v875_v25, %v1874_v3  ;;  %v322_v32 = vstv %s1395_s24 }
  0xac   :  { %v324_v37 = vmul.f32 %v322_v32, %v1879_v4  ;;  %v323_v41 = vmul.f32 %v322_v32, %v1869_v1  ;;  %v325_v47 = vmul.f32 %v322_v32, %v1864_v0 }
  0xad   :  { %v888_v39 = vrot.slane %v879_v31, 1  ;;  %v150_v31 = vstv %s149_s9 }
  0xae   :  { %v332_v45 = vrot.slane %v324_v37, 2  ;;  %v331_v46 = vrot.slane %v323_v41, 2  ;;  %v334_v51 = vrot.slane %v325_v47, 2  ;;  %v963_v37 = vstv %s1417_s28 }
  0xaf   :  { %808 = vrot.lane.b32.xlu1 %v797_v35, %s1698_s16  ;;  %806 = vrot.lane.b32.xlu0 %v796_v36, %s1698_s16  ;;  %v884_v35 = vrot.slane %v876_v30, 1  ;;  %v878_v36 = vmul.f32 %v875_v25, %v1864_v0  ;;  %v208_v30 = vstv %s1391_s2 }
  0xb0   :  { %v209_v41 = vmul.f32 %v208_v30, %v1869_v1 }
  0xb1   :  { %v887_v40 = vrot.slane %v878_v36, 1 }
  0xb3   :  { %250 = vrot.lane.b32.xlu1 %v243_v38, %s1697_s30  ;;  %248 = vrot.lane.b32.xlu0 %v244_v43, %s1697_s30  ;;  %v886_v38 = vsel %vm217_vm0, %v884_v35, %v885_v34  ;;  %v631_v43 = vstv %s1404_s25  ;;  %v889_v44 = vsel %vm217_vm0, %v887_v40, %v888_v39  ;;  %v2040_v40 = vmul.f32 %v208_v30, %v1879_v4 }
  0xb4   :  { %v633_v48 = vmul.f32 %v631_v43, %v1879_v4  ;;  %v632_v52 = vmul.f32 %v631_v43, %v1869_v1  ;;  %v635_v53 = vmul.f32 %v631_v43, %v1874_v3 }
  0xb6   :  { %v641_v56 = vrot.slane %v633_v48, 2  ;;  %v640_v57 = vrot.slane %v632_v52, 2  ;;  %v644_v59 = vrot.slane %v635_v53, 2  ;;  %v219_v52 = vrot.slane %v2040_v40, 1 }
  0xb7   :  { %254 = vrot.lane.b32.xlu1 %v246_v42, %s1697_s30  ;;  %252 = vrot.lane.b32.xlu0 %v247_v49, %s1697_s30  ;;  %v326_v42 = vmul.f32 %v322_v32, %v1874_v3  ;;  %v333_v49 = vsel %vm306_vm1, %v331_v46, %v332_v45  ;;  %v218_v53 = vrot.slane %v209_v41, 1 }
  0xb8   :  { %v642_v61 = vsel %vm306_vm1, %v640_v57, %v641_v56  ;;  %v154_v57 = vmul.f32 %v150_v31, %v1874_v3 }
  0xbb   :  { %560 = vrot.lane.b32.xlu1 %v553_v50, %s1697_s30  ;;  %558 = vrot.lane.b32.xlu0 %v554_v54, %s1697_s30  ;;  %v335_v50 = vrot.slane %v326_v42, 2  ;;  %v634_v54 = vmul.f32 %v631_v43, %v1864_v0  ;;  %v151_v42 = vmul.f32 %v150_v31, %v1869_v1  ;;  %v152_v43 = vmul.f32 %v150_v31, %v1879_v4 }
  0xbf   :  { %564 = vrot.lane.b32.xlu1 %v556_v55, %s1697_s30  ;;  %562 = vrot.lane.b32.xlu0 %v557_v60, %s1697_s30  ;;  %v336_v55 = vsel %vm306_vm1, %v334_v51, %v335_v50  ;;  %v643_v60 = vrot.slane %v634_v54, 2  ;;  %v2056_v54 = vmul.f32 %v208_v30, %v1874_v3 }
  0xc1   :  { %v645_v2 = vsel %vm306_vm1, %v643_v60, %v644_v59 }
  0xc3   :  { %282 = vrot.lane.b32.xlu1 %v275_v58, %s1698_s16  ;;  %280 = vrot.lane.b32.xlu0 %v276_v5, %s1698_s16  ;;  %v354_v58 = vstv %s1396_s6  ;;  %v663_v5 = vstv %s1405_s22 }
  0xc4   :  { %v356_v62 = vmul.f32 %v354_v58, %v1879_v4  ;;  %v355_v63 = vmul.f32 %v354_v58, %v1869_v1  ;;  %v358_v8 = vmul.f32 %v354_v58, %v1874_v3  ;;  %v357_v9 = vmul.f32 %v354_v58, %v1864_v0 }
  0xc5   :  { %v665_v10 = vmul.f32 %v663_v5, %v1879_v4  ;;  %v667_v18 = vmul.f32 %v663_v5, %v1874_v3  ;;  %v666_v19 = vmul.f32 %v663_v5, %v1864_v0  ;;  %v461_v58 = vstv %s2028_s5 }
  0xc6   :  { %v363_v7 = vrot.slane %v355_v63, 2  ;;  %v367_v13 = vrot.slane %v358_v8, 2  ;;  %v366_v14 = vrot.slane %v357_v9, 2  ;;  %v220_v9 = vsel %vm217_vm0, %v218_v53, %v219_v52 }
  0xc7   :  { %286 = vrot.lane.b32.xlu1 %v278_v6, %s1698_s16  ;;  %284 = vrot.lane.b32.xlu0 %v279_v11, %s1698_s16  ;;  %v364_v6 = vrot.slane %v356_v62, 2  ;;  %v664_v11 = vmul.f32 %v663_v5, %v1869_v1  ;;  %v673_v15 = vrot.slane %v665_v10, 2  ;;  %v676_v24 = vrot.slane %v667_v18, 2 }
  0xc8   :  { %v675_v25 = vrot.slane %v666_v19, 2  ;;  %v966_v62 = vmul.f32 %v963_v37, %v1864_v0  ;;  %v222_v10 = vrot.slane %v2056_v54, 1 }
  0xca   :  { %v975_v19 = vrot.slane %v966_v62, 2 }
  0xcb   :  { %592 = vrot.lane.b32.xlu1 %v585_v12, %s1698_s16  ;;  %590 = vrot.lane.b32.xlu0 %v586_v16, %s1698_s16  ;;  %v365_v12 = vsel %vm306_vm1, %v363_v7, %v364_v6  ;;  %v672_v16 = vrot.slane %v664_v11, 2 }
  0xcd   :  { %v674_v23 = vsel %vm306_vm1, %v672_v16, %v673_v15  ;;  %v462_v16 = vmul.f32 %v461_v58, %v1869_v1 }
  0xcf   :  { %596 = vrot.lane.b32.xlu1 %v588_v17, %s1698_s16  ;;  %594 = vrot.lane.b32.xlu0 %v589_v21, %s1698_s16  ;;  %v368_v17 = vsel %vm306_vm1, %v366_v14, %v367_v13 }
  0xd3   :  { %860 = vrot.lane.b32.xlu1 %v853_v22, %s1697_s30  ;;  %858 = vrot.lane.b32.xlu0 %v854_v27, %s1697_s30  ;;  %v931_v22 = vstv %s1416_s26 }
  0xd4   :  { %v932_v27 = vmul.f32 %v931_v22, %v1869_v1  ;;  %v935_v32 = vmul.f32 %v931_v22, %v1874_v3 }
  0xd6   :  { %v940_v36 = vrot.slane %v932_v27, 2  ;;  %v944_v47 = vrot.slane %v935_v32, 2 }
  0xd7   :  { %864 = vrot.lane.b32.xlu1 %v856_v26, %s1697_s30  ;;  %862 = vrot.lane.b32.xlu0 %v857_v33, %s1697_s30  ;;  %v933_v26 = vmul.f32 %v931_v22, %v1879_v4  ;;  %v934_v33 = vmul.f32 %v931_v22, %v1864_v0 }
  0xd9   :  { %v941_v35 = vrot.slane %v933_v26, 2  ;;  %v943_v48 = vrot.slane %v934_v33, 2  ;;  %v464_v33 = vmul.f32 %v461_v58, %v1864_v0 }
  0xdb   :  { %892 = vrot.lane.b32.xlu1 %v885_v34, %s1698_s16  ;;  %890 = vrot.lane.b32.xlu0 %v886_v38, %s1698_s16  ;;  %v677_v34 = vsel %vm306_vm1, %v675_v25, %v676_v24  ;;  %v942_v46 = vsel %vm306_vm1, %v940_v36, %v941_v35  ;;  %v945_v5 = vsel %vm306_vm1, %v943_v48, %v944_v47 }
  0xdf   :  { %896 = vrot.lane.b32.xlu1 %v888_v39, %s1698_s16  ;;  %894 = vrot.lane.b32.xlu0 %v889_v44, %s1698_s16  ;;  %v965_v44 = vmul.f32 %v963_v37, %v1879_v4 }
  0xe3   :  { %339 = vrot.lane.b32.xlu1 %v332_v45, %s1697_s30  ;;  %337 = vrot.lane.b32.xlu0 %v333_v49, %s1697_s30  ;;  %v964_v45 = vmul.f32 %v963_v37, %v1869_v1  ;;  %v519_v49 = vstv %s1400_s29 }
  0xe5   :  { %v972_v60 = vrot.slane %v964_v45, 2 }
  0xe7   :  { %343 = vrot.lane.b32.xlu1 %v335_v50, %s1697_s30  ;;  %341 = vrot.lane.b32.xlu0 %v336_v55, %s1697_s30  ;;  %v211_v55 = vmul.f32 %v208_v30, %v1864_v0 }
  0xe9   :  { %v221_v11 = vrot.slane %v211_v55, 1 }
  0xeb   :  { %648 = vrot.lane.b32.xlu1 %v641_v56, %s1697_s30  ;;  %646 = vrot.lane.b32.xlu0 %v642_v61, %s1697_s30  ;;  %v153_v56 = vmul.f32 %v150_v31, %v1864_v0  ;;  %v967_v61 = vmul.f32 %v963_v37, %v1874_v3  ;;  %v223_v27 = vsel %vm217_vm0, %v221_v11, %v222_v10 }
  0xec   :  { %v522_v31 = vmul.f32 %v519_v49, %v1864_v0 }
  0xed   :  { %v976_v18 = vrot.slane %v967_v61, 2 }
  0xee   :  { %v531_v45 = vrot.slane %v522_v31, 1 }
  0xef   :  { %652 = vrot.lane.b32.xlu1 %v644_v59, %s1697_s30  ;;  %650 = vrot.lane.b32.xlu0 %v645_v2, %s1697_s30  ;;  %v973_v59 = vrot.slane %v965_v44, 2  ;;  %v977_v36 = vsel %vm306_vm1, %v975_v19, %v976_v18 }
  0xf3   :  { %371 = vrot.lane.b32.xlu1 %v364_v6, %s1698_s16  ;;  %369 = vrot.lane.b32.xlu0 %v365_v12, %s1698_s16  ;;  %v2068_v6 = vmul.f32 %v519_v49, %v1879_v4  ;;  %v520_v12 = vmul.f32 %v519_v49, %v1869_v1 }
  0xf5   :  { %v2021_v20 = vpop.permute.xlu1 %169  ;;  %v166_v21 = vpop.permute.xlu0 %165  ;;  %v528_v30 = vrot.slane %v520_v12, 1 }
  0xf6   :  { %v177_v63 = vadd.f32 %v166_v21, %v151_v42  ;;  %v179_v21 = vadd.f32 %v2021_v20, %v153_v56 }
  0xf7   :  { %375 = vrot.lane.b32.xlu1 %v367_v13, %s1698_s16  ;;  %373 = vrot.lane.b32.xlu0 %v368_v17, %s1698_s16  ;;  %v463_v13 = vmul.f32 %v461_v58, %v1879_v4  ;;  %v974_v17 = vsel %vm306_vm1, %v972_v60, %v973_v59  ;;  %v761_v60 = vstv %s1409_s1 }
  0xf9   :  { %v172_v28 = vpop.permute.xlu1 %171  ;;  %v168_v29 = vpop.permute.xlu0 %167 }
  0xfa   :  { %v178_v2 = vadd.f32 %v168_v29, %v152_v43  ;;  %v180_v22 = vadd.f32 %v172_v28, %v154_v57  ;;  %v529_v29 = vrot.slane %v2068_v6, 1  ;;  %v465_v28 = vmul.f32 %v461_v58, %v1874_v3 }
  0xfb   :  { %680 = vrot.lane.b32.xlu1 %v673_v15, %s1698_s16  ;;  %678 = vrot.lane.b32.xlu0 %v674_v23, %s1698_s16  ;;  %v819_v58 = vstv %s1412_s27 }
  0xfc   :  { %v530_v43 = vsel %vm217_vm0, %v528_v30, %v529_v29  ;;  %v2131_v11 = vmul.f32 %v819_v58, %v1874_v3  ;;  %v822_v12 = vmul.f32 %v819_v58, %v1864_v0 }
  0xfd   :  { %v2035_v38 = vpop.permute.xlu1 %478  ;;  %v2037_v39 = vpop.permute.xlu0 %476 }
  0xff   :  { %684 = vrot.lane.b32.xlu1 %v676_v24, %s1698_s16  ;;  %682 = vrot.lane.b32.xlu0 %v677_v34, %s1698_s16  ;;  %v2086_v24 = vmul.f32 %v519_v49, %v1874_v3  ;;  %v489_v34 = vadd.f32 %v2035_v38, %v463_v13 }
 0x101   :  { %v2050_v50 = vpop.permute.xlu1 %482  ;;  %v2052_v51 = vpop.permute.xlu0 %480  ;;  %v532_v44 = vrot.slane %v2086_v24, 1 }
 0x102   :  { %v491_v38 = vadd.f32 %v2050_v50, %v465_v28  ;;  %v2124_v50 = vmul.f32 %v819_v58, %v1879_v4 }
 0x103   :  { %948 = vrot.lane.b32.xlu1 %v941_v35, %s1697_s30  ;;  %946 = vrot.lane.b32.xlu0 %v942_v46, %s1697_s30  ;;  %v488_v35 = vadd.f32 %v2037_v39, %v462_v16  ;;  %v490_v39 = vadd.f32 %v2052_v51, %v464_v33  ;;  %v533_v55 = vsel %vm217_vm0, %v531_v45, %v532_v44 }
 0x104   :  { %v820_v51 = vmul.f32 %v819_v58, %v1869_v1  ;;  %v765_v16 = vmul.f32 %v761_v60, %v1874_v3 }
 0x105   :  { %v194_v7 = vpop.permute.xlu1 %193  ;;  %v192_v8 = vpop.permute.xlu0 %191 }
 0x106   :  { %v2076_v14 = vadd.f32 %v194_v7, %v178_v2  ;;  %v203_v15 = vadd.f32 %v192_v8, %v177_v63  ;;  %v763_v63 = vmul.f32 %v761_v60, %v1879_v4  ;;  %v762_v2 = vmul.f32 %v761_v60, %v1869_v1 }
 0x107   :  { %952 = vrot.lane.b32.xlu1 %v944_v47, %s1697_s30  ;;  %950 = vrot.lane.b32.xlu0 %v945_v5, %s1697_s30  ;;  %v829_v8 = vrot.slane %v2124_v50, 1  ;;  %s1394_s30 = sld [smem:[#allocation2 + $0x6]] }
 0x108   :  { %v2083_v23 = vadd.f32 %v220_v9, %v203_v15  ;;  %v828_v9 = vrot.slane %v820_v51, 1 }
 0x109   :  { %v198_v25 = vpop.permute.xlu1 %197  ;;  %v196_v26 = vpop.permute.xlu0 %195 }
 0x10a   :  { %v2093_v32 = vadd.f32 %v198_v25, %v180_v22  ;;  %v205_v20 = vadd.f32 %v196_v26, %v179_v21  ;;  %v830_v21 = vsel %vm217_vm0, %v828_v9, %v829_v8  ;;  %v832_v22 = vrot.slane %v2131_v11, 1 }
 0x10b   :  { %980 = vrot.lane.b32.xlu1 %v973_v59, %s1698_s16  ;;  %978 = vrot.lane.b32.xlu0 %v974_v17, %s1698_s16  ;;  %v764_v17 = vmul.f32 %v761_v60, %v1864_v0  ;;  %v831_v25 = vrot.slane %v822_v12, 1 }
 0x10c   :  { %v2102_v37 = vadd.f32 %v223_v27, %v205_v20 }
 0x10d   :  { %v505_v41 = vpop.permute.xlu1 %504  ;;  %v503_v42 = vpop.permute.xlu0 %502 }
 0x10e   :  { %v2108_v46 = vadd.f32 %v505_v41, %v489_v34  ;;  %v514_v47 = vadd.f32 %v503_v42, %v488_v35  ;;  %v833_v34 = vsel %vm217_vm0, %v831_v25, %v832_v22 }
 0x10f   :  { %984 = vrot.lane.b32.xlu1 %v976_v18, %s1698_s16  ;;  %982 = vrot.lane.b32.xlu0 %v977_v36, %s1698_s16  ;;  %s385_s16 = sld [smem:[#allocation7]] }
 0x110   :  { %v2114_v48 = vadd.f32 %v530_v43, %v514_v47 }
 0x111   :  { %v509_v49 = vpop.permute.xlu1 %508  ;;  %v507_v53 = vpop.permute.xlu0 %506 }
 0x112   :  { %v2119_v56 = vadd.f32 %v509_v49, %v491_v38  ;;  %v516_v57 = vadd.f32 %v507_v53, %v490_v39  ;;  %v297_v38 = vstv %s1394_s30 }
 0x113   :  { %v2158_v53 = vmul.f32 %v297_v38, %v1879_v4  ;;  %v300_v58 = vmul.f32 %v297_v38, %v1864_v0 }
 0x114   :  { %v2121_v59 = vadd.f32 %v533_v55, %v516_v57  ;;  %v298_v55 = vmul.f32 %v297_v38, %v1869_v1  ;;  %v2162_v57 = vmul.f32 %v297_v38, %v1874_v3 }
 0x115   :  { %v779_v61 = vpop.permute.xlu1 %778  ;;  %v777_v62 = vpop.permute.xlu0 %776 }
 0x116   :  { %v789_v13 = vadd.f32 %v779_v61, %v763_v63  ;;  %v788_v15 = vadd.f32 %v777_v62, %v762_v2  ;;  %v308_v62 = vrot.slane %v2158_v53, 2  ;;  %v307_v51 = vrot.slane %v298_v55, 2 }
 0x117   :  { %v607_v63 = vstv %s1403_s0 }
 0x119   :  { %v783_v5 = vpop.permute.xlu1 %782  ;;  %v781_v7 = vpop.permute.xlu0 %780 }
 0x11a   :  { %v791_v30 = vadd.f32 %v783_v5, %v765_v16  ;;  %v790_v31 = vadd.f32 %v781_v7, %v764_v17  ;;  %v311_v5 = vrot.slane %v2162_v57, 2  ;;  %v310_v7 = vrot.slane %v300_v58, 2 }
 0x11b   :  { %v608_v16 = vmul.f32 %v607_v63, %v1869_v1 }
 0x11d   :  { %v805_v18 = vpop.permute.xlu1 %804  ;;  %v803_v19 = vpop.permute.xlu0 %802 }
 0x11e   :  { %v2140_v26 = vadd.f32 %v805_v18, %v789_v13  ;;  %v814_v27 = vadd.f32 %v803_v19, %v788_v15  ;;  %v309_v13 = vsel %vm306_vm1, %v307_v51, %v308_v62  ;;  %v2176_v15 = vmul.f32 %v607_v63, %v1879_v4 }
 0x120   :  { %v2142_v20 = vadd.f32 %v830_v21, %v814_v27  ;;  %v617_v27 = vrot.slane %v2176_v15, 2 }
 0x121   :  { %v809_v28 = vpop.permute.xlu1 %808  ;;  %v807_v33 = vpop.permute.xlu0 %806 }
 0x122   :  { %v2147_v35 = vadd.f32 %v809_v28, %v791_v30  ;;  %v816_v36 = vadd.f32 %v807_v33, %v790_v31  ;;  %v616_v30 = vrot.slane %v608_v16, 2  ;;  %v2189_v31 = vmul.f32 %v607_v63, %v1874_v3 }
 0x123   :  { %v610_v28 = vmul.f32 %v607_v63, %v1864_v0 }
 0x124   :  { %v2149_v41 = vadd.f32 %v833_v34, %v816_v36  ;;  %v620_v38 = vrot.slane %v2189_v31, 2  ;;  %v839_v31 = vadd.f32 %v829_v8, %v2140_v26  ;;  %v841_v8 = vadd.f32 %v832_v22, %v2147_v35 }
 0x125   :  { %v2151_v42 = vpop.permute.xlu1 %250  ;;  %v249_v43 = vpop.permute.xlu0 %248  ;;  %v619_v55 = vrot.slane %v610_v28, 2 }
 0x126   :  { %v260_v2 = vadd.f32 %v249_v43, %v2083_v23  ;;  %v312_v23 = vsel %vm306_vm1, %v310_v7, %v311_v5 }
 0x129   :  { %v2153_v45 = vpop.permute.xlu1 %254  ;;  %v253_v47 = vpop.permute.xlu0 %252 }
 0x12a   :  { %v262_v18 = vadd.f32 %v253_v47, %v2102_v37  ;;  %v618_v47 = vsel %vm306_vm1, %v616_v30, %v617_v27 }
 0x12d   :  { %v2155_v39 = vpop.permute.xlu1 %560  ;;  %v559_v49 = vpop.permute.xlu0 %558 }
 0x12e   :  { %v570_v37 = vadd.f32 %v559_v49, %v2114_v48  ;;  %v621_v48 = vsel %vm306_vm1, %v619_v55, %v620_v38 }
 0x131   :  { %v2165_v60 = vpop.permute.xlu1 %564  ;;  %v563_v61 = vpop.permute.xlu0 %562 }
 0x132   :  { %v572_v51 = vadd.f32 %v563_v61, %v2121_v59 }
 0x135   :  { %v2170_v9 = vpop.permute.xlu1 %282  ;;  %v281_v12 = vpop.permute.xlu0 %280 }
 0x136   :  { %v292_v17 = vadd.f32 %v281_v12, %v260_v2  ;;  %v907_v12 = vstv %s1415_s4 }
 0x137   :  { %v908_v59 = vmul.f32 %v907_v12, %v1869_v1  ;;  %v2219_v28 = vmul.f32 %v907_v12, %v1874_v3 }
 0x138   :  { %v2180_v19 = vadd.f32 %v309_v13, %v292_v17 }
 0x139   :  { %v2185_v21 = vpop.permute.xlu1 %286  ;;  %v285_v25 = vpop.permute.xlu0 %284  ;;  %v916_v30 = vrot.slane %v908_v59, 2 }
 0x13a   :  { %v294_v33 = vadd.f32 %v285_v25, %v262_v18  ;;  %v2212_v18 = vmul.f32 %v907_v12, %v1879_v4  ;;  %v920_v4 = vrot.slane %v2219_v28, 2 }
 0x13c   :  { %v2193_v34 = vadd.f32 %v312_v23, %v294_v33  ;;  %v917_v25 = vrot.slane %v2212_v18, 2  ;;  %v910_v33 = vmul.f32 %v907_v12, %v1864_v0 }
 0x13d   :  { %v593_v36 = vpop.permute.xlu1 %592  ;;  %v591_v43 = vpop.permute.xlu0 %590 }
 0x13e   :  { %v602_v58 = vadd.f32 %v591_v43, %v570_v37  ;;  %v918_v1 = vsel %vm306_vm1, %v916_v30, %v917_v25  ;;  %v919_v55 = vrot.slane %v910_v33, 2 }
 0x140   :  { %v2200_v2 = vadd.f32 %v618_v47, %v602_v58 }
 0x141   :  { %v2202_v63 = vpop.permute.xlu1 %596  ;;  %v595_v7 = vpop.permute.xlu0 %594 }
 0x142   :  { %v604_v49 = vadd.f32 %v595_v7, %v572_v51 }
 0x144   :  { %v2207_v13 = vadd.f32 %v621_v48, %v604_v49 }
 0x145   :  { %v2209_v16 = vpop.permute.xlu1 %860  ;;  %v859_v17 = vpop.permute.xlu0 %858 }
 0x146   :  { %v870_v37 = vadd.f32 %v859_v17, %v2142_v20  ;;  %v921_v20 = vsel %vm306_vm1, %v919_v55, %v920_v4 }
 0x149   :  { %v2215_v61 = vpop.permute.xlu1 %864  ;;  %v863_v23 = vpop.permute.xlu0 %862 }
 0x14a   :  { %v872_v51 = vadd.f32 %v863_v23, %v2149_v41  ;;  %v229_v41 = vadd.f32 %v219_v52, %v2076_v14 }
 0x14c   :  { %v261_v23 = vadd.f32 %v2151_v42, %v229_v41 }
 0x14d   :  { %v2223_v43 = vpop.permute.xlu1 %892  ;;  %v891_v47 = vpop.permute.xlu0 %890 }
 0x14e   :  { %v902_v58 = vadd.f32 %v891_v47, %v870_v37  ;;  %v231_v47 = vadd.f32 %v222_v10, %v2093_v32 }
 0x150   :  { %v2230_v7 = vadd.f32 %v918_v1, %v902_v58  ;;  %v293_v1 = vadd.f32 %v2170_v9, %v261_v23  ;;  %v263_v55 = vadd.f32 %v2153_v45, %v231_v47  ;;  %v539_v58 = vadd.f32 %v529_v29, %v2108_v46 }
 0x151   :  { %v2232_v3 = vpop.permute.xlu1 %896  ;;  %v895_v0 = vpop.permute.xlu0 %894  ;;  %v541_v45 = vadd.f32 %v532_v44, %v2119_v56  ;;  %v386_v29 = vstv %s385_s16 }
 0x152   :  { %v904_v48 = vadd.f32 %v895_v0, %v872_v51  ;;  %v295_v14 = vadd.f32 %v2185_v21, %v263_v55  ;;  %v318_v42 = vadd.f32 %v308_v62, %v293_v1  ;;  %v571_v54 = vadd.f32 %v2155_v39, %v539_v58 }
 0x153   :  { %v573_v39 = vadd.f32 %v2165_v60, %v541_v45  ;;  %v392_v51 = vstv %s391_s17 }
 0x154   :  { %v2237_v49 = vadd.f32 %v921_v20, %v904_v48  ;;  %v603_v6 = vadd.f32 %v593_v36, %v571_v54  ;;  %v320_v21 = vadd.f32 %v311_v5, %v295_v14  ;;  %v398_v5 = vstv %s397_s18 }
 0x155   :  { %v340_v12 = vpop.permute.xlu1 %339  ;;  %v338_v17 = vpop.permute.xlu0 %337  ;;  %v605_v56 = vadd.f32 %v2202_v63, %v573_v39 }
 0x156   :  { %v350_v10 = vadd.f32 %v340_v12, %v318_v42  ;;  %v349_v32 = vadd.f32 %v338_v17, %v2180_v19  ;;  %v627_v36 = vadd.f32 %v617_v27, %v603_v6  ;;  %v701_v27 = vstv %s1407_s19 }
 0x157   :  { %v629_v15 = vadd.f32 %v620_v38, %v605_v56 }
 0x159   :  { %v344_v59 = vpop.permute.xlu1 %343  ;;  %v342_v30 = vpop.permute.xlu0 %341 }
 0x15a   :  { %v352_v19 = vadd.f32 %v344_v59, %v320_v21  ;;  %v351_v0 = vadd.f32 %v342_v30, %v2193_v34  ;;  %v695_v59 = vstv %s1406_s3 }
 0x15d   :  { %v649_v33 = vpop.permute.xlu1 %648  ;;  %v647_v37 = vpop.permute.xlu0 %646 }
 0x15e   :  { %v659_v41 = vadd.f32 %v649_v33, %v627_v36  ;;  %v658_v23 = vadd.f32 %v647_v37, %v2200_v2 }
 0x161   :  { %v653_v40 = vpop.permute.xlu1 %652  ;;  %v651_v52 = vpop.permute.xlu0 %650 }
 0x162   :  { %v661_v54 = vadd.f32 %v653_v40, %v629_v15 }
 0x165   :  { %v372_v46 = vpop.permute.xlu1 %371  ;;  %v370_v9 = vpop.permute.xlu0 %369 }
 0x166   :  { %v382_v53 = vadd.f32 %v372_v46, %v350_v10  ;;  %v381_v62 = vadd.f32 %v370_v9, %v349_v32  ;;  %v707_v10 = vstv %s2262_s21  ;;  %v660_v32 = vadd.f32 %v651_v52, %v2207_v13 }
 0x167   :  { %v871_v13 = vadd.f32 %v2209_v16, %v839_v31 }
 0x168   :  { %v388_v24 = vadd.f32 %v386_v29, %v382_v53  ;;  %v387_v44 = vadd.f32 %v386_v29, %v381_v62 }
 0x169   :  { %v376_v20 = vpop.permute.xlu1 %375  ;;  %v374_v57 = vpop.permute.xlu0 %373  ;;  %v903_v26 = vadd.f32 %v2223_v43, %v871_v13 }
 0x16a   :  { %v394_v48 = vmul.f32 %v392_v51, %v388_v24  ;;  %v393_v12 = vmul.f32 %v392_v51, %v387_v44  ;;  %v384_v17 = vadd.f32 %v376_v20, %v352_v19  ;;  %v383_v60 = vadd.f32 %v374_v57, %v351_v0 }
 0x16b   :  { %v927_v11 = vadd.f32 %v917_v25, %v903_v26  ;;  %v995_v25 = vstv %s1418_s23  ;;  %s1702_s23 = smov [#allocation18]  }
 0x16c   :  { %v390_v47 = vadd.f32 %v386_v29, %v384_v17  ;;  %v389_v34 = vadd.f32 %v386_v29, %v383_v60  ;;  %v400_v30 = vadd.f32 %v398_v5, %v394_v48  ;;  %v399_v1 = vadd.f32 %v398_v5, %v393_v12 }
 0x16d   :  { %v681_v63 = vpop.permute.xlu1 %680  ;;  %v679_v55 = vpop.permute.xlu0 %678  ;;  %v873_v48 = vadd.f32 %v2215_v61, %v841_v8 }
 0x16e   :  { %v396_v58 = vmul.f32 %v392_v51, %v390_v47  ;;  %v395_v14 = vmul.f32 %v392_v51, %v389_v34  ;;  %v691_v42 = vadd.f32 %v681_v63, %v659_v41  ;;  %v690_v33 = vadd.f32 %v679_v55, %v658_v23 }
 0x16f   :  { %v404_v2 = vmax.f32 %v400_v30, 0.0  ;;  %v403_v37 = vmax.f32 %v399_v1, 0.0  ;;  %v905_v60 = vadd.f32 %v2232_v3, %v873_v48  ;;  %v1001_v55 = vstv %s1419_s8  ;;  %s1374_s8 = sshll.u32 %s1702_s23, 4  ;;  %s1375_s8 = int_to_ptr.vmem [resolvable:$true] %s1374_s8 }
 0x170   :  { %v697_v45 = vadd.f32 %v695_v59, %v691_v42  ;;  %v696_v6 = vadd.f32 %v695_v59, %v690_v33  ;;  %v401_v29 = vadd.f32 %v398_v5, %v395_v14  ;;  %v402_v53 = vadd.f32 %v398_v5, %v396_v58  ;;  %p1654_p7 = scmp.lt.s32.totalorder %s1375_s8, %s1375_s8 }
 0x171   :  { %v685_v38 = vpop.permute.xlu1 %684  ;;  %v412_v46 = vsel %vm411_vm2, %v404_v2, 0.0  ;;  %v683_v9 = vpop.permute.xlu0 %682  ;;  %v408_v21 = vsel %vm407_vm3, %v403_v37, 0.0  ;;  %v929_v15 = vadd.f32 %v920_v4, %v905_v60  ;;  %v1007_v37 = vstv %s1420_s20 }
 0x172   :  { %v703_v40 = vmul.f32 %v701_v27, %v697_v45  ;;  %v702_v62 = vmul.f32 %v701_v27, %v696_v6  ;;  %v693_v39 = vadd.f32 %v685_v38, %v661_v54  ;;  %413 = vadd.xlane.f32.xlu1 %v412_v46  ;;  %v692_v51 = vadd.f32 %v683_v9, %v660_v32 }
 0x173   :  { %409 = vadd.xlane.f32.xlu0 %v408_v21  ;;  %v405_v52 = vmax.f32 %v401_v29, 0.0  ;;  %v406_v57 = vmax.f32 %v402_v53, 0.0 }
 0x174   :  { %v699_v19 = vadd.f32 %v695_v59, %v693_v39  ;;  %v698_v0 = vadd.f32 %v695_v59, %v692_v51  ;;  %v708_v50 = vadd.f32 %v707_v10, %v702_v62  ;;  %v709_v16 = vadd.f32 %v707_v10, %v703_v40 }
 0x175   :  { %v949_v24 = vpop.permute.xlu1 %948  ;;  %v947_v44 = vpop.permute.xlu0 %946  ;;  %v415_v56 = vsel %vm407_vm3, %v405_v52, 0.0  ;;  %v418_v41 = vsel %vm411_vm2, %v406_v57, 0.0 }
 0x176   :  { %v705_v36 = vmul.f32 %v701_v27, %v699_v19  ;;  %v704_v20 = vmul.f32 %v701_v27, %v698_v0  ;;  %v712_v5 = vmax.f32 %v708_v50, 0.0  ;;  %v713_v59 = vmax.f32 %v709_v16, 0.0 }
 0x177   :  { %416 = vadd.xlane.f32.xlu0 %v415_v56  ;;  %v959_v47 = vadd.f32 %v949_v24, %v927_v11  ;;  %v958_v61 = vadd.f32 %v947_v44, %v2230_v7  ;;  %v430_v19 = vlaneseq }
 0x178   :  { %v710_v12 = vadd.f32 %v707_v10, %v704_v20  ;;  %v716_v35 = vsel %vm407_vm3, %v712_v5, 0.0  ;;  %v711_v17 = vadd.f32 %v707_v10, %v705_v36  ;;  %v719_v63 = vsel %vm411_vm2, %v713_v59, 0.0 }
 0x179   :  { %v953_v22 = vpop.permute.xlu1 %952  ;;  %v951_v43 = vpop.permute.xlu0 %950  ;;  %717 = vadd.xlane.f32.xlu1 %v716_v35  ;;  %v431_v0 = vand.u32 127, %v430_v19  ;;  %v433_v8 = vshrl.u32 %v430_v19, 7 }
 0x17a   :  { %v714_v23 = vmax.f32 %v710_v12, 0.0  ;;  %v715_v1 = vmax.f32 %v711_v17, 0.0  ;;  %v961_v58 = vadd.f32 %v953_v22, %v929_v15  ;;  %v960_v14 = vadd.f32 %v951_v43, %v2237_v49 }
 0x17b   :  { %419 = vadd.xlane.f32.xlu0 %v418_v41  ;;  %v436_v26 = vadd.s32 4294967288, %v431_v0  ;;  %v434_v20 = vsub.s32 %v431_v0, %v433_v8 }
 0x17c   :  { %v722_v18 = vsel %vm407_vm3, %v714_v23, 0.0  ;;  %v725_v2 = vsel %vm411_vm2, %v715_v1, 0.0 }
 0x17d   :  { %v981_v34 = vpop.permute.xlu1 %980  ;;  %v979_v30 = vpop.permute.xlu0 %978  ;;  %723 = vadd.xlane.f32.xlu1 %v722_v18  ;;  %v439_v56 = vsub.s32 %v436_v26, %v433_v8  ;;  %v1422_v26 = vld [vmem:[#allocation12 + $0x1] ss:$0 sm:$0xff] }
 0x17e   :  { %v991_v27 = vadd.f32 %v981_v34, %v959_v47  ;;  %v990_v3 = vadd.f32 %v979_v30, %v958_v61 }
 0x17f   :  { %720 = vadd.xlane.f32.xlu0 %v719_v63 }
 0x180   :  { %v997_v7 = vadd.f32 %v995_v25, %v991_v27  ;;  %v996_v42 = vadd.f32 %v995_v25, %v990_v3 }
 0x181   :  { %v985_v33 = vpop.permute.xlu1 %984  ;;  %v983_v54 = vpop.permute.xlu0 %982 }
 0x182   :  { %v1003_v10 = vmul.f32 %v1001_v55, %v997_v7  ;;  %v1002_v28 = vmul.f32 %v1001_v55, %v996_v42  ;;  %v993_v4 = vadd.f32 %v985_v33, %v961_v58  ;;  %v992_v32 = vadd.f32 %v983_v54, %v960_v14 }
 0x183   :  { %726 = vadd.xlane.f32.xlu0 %v725_v2 }
 0x184   :  { %v999_v45 = vadd.f32 %v995_v25, %v993_v4  ;;  %v998_v6 = vadd.f32 %v995_v25, %v992_v32  ;;  %v1008_v29 = vadd.f32 %v1007_v37, %v1002_v28  ;;  %v1009_v31 = vadd.f32 %v1007_v37, %v1003_v10 }
 0x186   :  { %v1005_v38 = vmul.f32 %v1001_v55, %v999_v45  ;;  %v1004_v46 = vmul.f32 %v1001_v55, %v998_v6  ;;  %v1012_v9 = vmax.f32 %v1008_v29, 0.0  ;;  %v1013_v49 = vmax.f32 %v1009_v31, 0.0 }
 0x188   :  { %v1016_v21 = vsel %vm407_vm3, %v1012_v9, 0.0  ;;  %v1019_v53 = vsel %vm411_vm2, %v1013_v49, 0.0  ;;  %v1010_v40 = vadd.f32 %v1007_v37, %v1004_v46  ;;  %v1011_v62 = vadd.f32 %v1007_v37, %v1005_v38  ;;  %v1088_v9 = vld [vmem:[%s2374_s7] sm:$0xff]  ;;  %v1089_v49 = vld [vmem:[%s2374_s7 + $0x8] sm:$0xff] }
 0x189   :  { %1017 = vadd.xlane.f32.xlu1 %v1016_v21  ;;  %1020 = vadd.xlane.f32.xlu0 %v1019_v53  ;;  %v1482_v21 = vpack.c.bf16 %v1089_v49, %v1088_v9  ;;  %v1699_v53 = vmov 0.0|0.0  }
 0x18a   :  { %v1014_v39 = vmax.f32 %v1010_v40, 0.0  ;;  %v1015_v51 = vmax.f32 %v1011_v62, 0.0  ;;  %1481 = vmatprep.subr.bf16.mxu0 %v1699_v53  ;;  %1487 = vmatprep.subr.bf16.mxu1 %v1699_v53  ;;  %v1090_v40 = vld [vmem:[%s2374_s7 + $0x10] sm:$0xff]  ;;  %v1091_v62 = vld [vmem:[%s2374_s7 + $0x18] sm:$0xff] }
 0x18b   :  { %1483 = vmatpush3.bf16.msra.mxu0 %v1482_v21 }
 0x18c   :  { %v1022_v13 = vsel %vm407_vm3, %v1014_v39, 0.0  ;;  %v1025_v52 = vsel %vm411_vm2, %v1015_v51, 0.0  ;;  %1484 = vmatprep.subr.bf16.mxu0 %v1699_v53  ;;  %v1485_v39 = vpack.c.bf16 %v1091_v62, %v1090_v40  ;;  %v1701_v51 = vmov 0.0  }
 0x18d   :  { %1023 = vadd.xlane.f32.xlu1 %v1022_v13  ;;  %1026 = vadd.xlane.f32.xlu0 %v1025_v52  ;;  %v1173_v13 = vld [vmem:[#allocation16] sm:$0xff]  ;;  %v1174_v52 = vld [vmem:[#allocation16 + $0x8] sm:$0xff] }
 0x18e   :  { %1456 = vmatprep.mubr.msk.f32.mxu0 %vm1700_vm7, %v1701_v51  ;;  %1467 = vmatprep.mubr.msk.f32.mxu1 %vm1700_vm7, %v1701_v51  ;;  %v1488_v19 = vpack.c.bf16 %v1174_v52, %v1173_v13 }
 0x18f   :  { %1486 = vmatpush3.bf16.msra.mxu0 %v1485_v39 }
 0x190   :  { %1493 = vmatprep.subr.bf16.mxu0 %v1699_v53  ;;  %1489 = vmatpush3.bf16.msra.mxu1 %v1488_v19 }
 0x191   :  { %1490 = vmatprep.subr.bf16.mxu1 %v1699_v53 }
 0x1ff   :  { %v414_v24 = vpop.xlane.xlu1 %413 }
 0x200   :  { %v410_v50 = vpop.xlane.xlu0 %409  ;;  %v423_v36 = vmul.f32 0.071428575, %v414_v24 }
 0x201   :  { %v422_v57 = vmul.f32 0.071428575, %v410_v50 }
 0x202   :  { %v440_v12 = vrot.slane %v423_v36, %v439_v56  ;;  %v1423_v36 = vld [vmem:[#allocation12 + $0x2] ss:$0 sm:$0xff] }
 0x203   :  { %v435_v11 = vrot.slane %v422_v57, %v434_v20 }
 0x204   :  { %v417_v44 = vpop.xlane.xlu0 %416 }
 0x205   :  { %v424_v16 = vmul.f32 0.071428575, %v417_v44  ;;  %v442_v23 = vsel %vm441_vm4, %v440_v12, %v435_v11  ;;  %v1421_v44 = vld [vmem:[#allocation12] ss:$0 sm:$0xff]  ;;  %v1424_v12 = vld [vmem:[#allocation13] ss:$0 sm:$0xff] }
 0x206   :  { %v718_v5 = vpop.xlane.xlu1 %717 }
 0x207   :  { %v446_v35 = vrot.slane %v424_v16, %v434_v20  ;;  %v728_v61 = vmul.f32 0.071428575, %v718_v5 }
 0x208   :  { %v420_v48 = vpop.xlane.xlu0 %419 }
 0x209   :  { %v425_v22 = vmul.f32 0.071428575, %v420_v48  ;;  %v739_v15 = vrot.slane %v728_v61, %v434_v20  ;;  %v1283_v61 = vld [vmem:[%s2380_s13 + $0x8] sm:$0xff] }
 0x20a   :  { %v724_v17 = vpop.xlane.xlu1 %723 }
 0x20b   :  { %v450_v43 = vrot.slane %v425_v22, %v439_v56  ;;  %v730_v18 = vmul.f32 0.071428575, %v724_v17 }
 0x20c   :  { %v721_v60 = vpop.xlane.xlu0 %720 }
 0x20d   :  { %v729_v41 = vmul.f32 0.071428575, %v721_v60  ;;  %v451_v59 = vsel %vm441_vm4, %v450_v43, %v446_v35  ;;  %v748_v27 = vrot.slane %v730_v18, %v434_v20  ;;  %v1175_v35 = vld [vmem:[#allocation16 + $0x10] sm:$0xff]  ;;  %v1176_v43 = vld [vmem:[#allocation16 + $0x18] sm:$0xff] }
 0x20e   :  { %v453_v47 = vsel %vm452_vm5, %v451_v59, %v442_v23  ;;  %v1491_v17 = vpack.c.bf16 %v1176_v43, %v1175_v35  ;;  %v1425_v60 = vld [vmem:[#allocation15] ss:$0 sm:$0xff] }
 0x20f   :  { %v456_v25 = vsel %vm455_vm6, %v453_v47, 0.0  ;;  %v743_v30 = vrot.slane %v729_v41, %v439_v56  ;;  %v1282_v47 = vld [vmem:[%s2380_s13] sm:$0xff] }
 0x210   :  { %457 = vadd.xlane.f32.xlu1 %v456_v25  ;;  %v727_v34 = vpop.xlane.xlu0 %726  ;;  %1492 = vmatpush3.bf16.msra.mxu1 %v1491_v17  ;;  %v1494_v18 = vpack.c.bf16 %v1283_v61, %v1282_v47  ;;  %v1284_v25 = vld [vmem:[%s2380_s13 + $0x10] sm:$0xff] }
 0x211   :  { %v731_v1 = vmul.f32 0.071428575, %v727_v34  ;;  %v744_v63 = vsel %vm441_vm4, %v743_v30, %v739_v15  ;;  %v1285_v34 = vld [vmem:[%s2380_s13 + $0x18] sm:$0xff] }
 0x212   :  { %v1497_v30 = vpack.c.bf16 %v1285_v34, %v1284_v25 }
 0x213   :  { %v752_v3 = vrot.slane %v731_v1, %v439_v56  ;;  %v1427_v1 = vld [vmem:[%s2377_s10] ss:$0 sm:$0xff] }
 0x215   :  { %v753_v55 = vsel %vm441_vm4, %v752_v3, %v748_v27 }
 0x216   :  { %v1018_v58 = vpop.xlane.xlu1 %1017  ;;  %v754_v14 = vsel %vm452_vm5, %v753_v55, %v744_v63  ;;  %v1021_v7 = vpop.xlane.xlu0 %1020 }
 0x217   :  { %v1028_v42 = vmul.f32 0.071428575, %v1018_v58  ;;  %v756_v33 = vsel %vm455_vm6, %v754_v14, 0.0  ;;  %v1029_v54 = vmul.f32 0.071428575, %v1021_v7 }
 0x218   :  { %757 = vadd.xlane.f32.xlu0 %v756_v33 }
 0x219   :  { %v1039_v10 = vrot.slane %v1028_v42, %v434_v20  ;;  %v1043_v28 = vrot.slane %v1029_v54, %v439_v56 }
 0x21a   :  { %v1024_v2 = vpop.xlane.xlu1 %1023  ;;  %v1027_v37 = vpop.xlane.xlu0 %1026 }
 0x21b   :  { %v1030_v4 = vmul.f32 0.071428575, %v1024_v2  ;;  %v1031_v32 = vmul.f32 0.071428575, %v1027_v37  ;;  %v1044_v29 = vsel %vm441_vm4, %v1043_v28, %v1039_v10  ;;  %v1429_v2 = vld [vmem:[%s2378_s11] ss:$0 sm:$0xff] }
 0x21c   :  { %v1430_v10 = vld [vmem:[%s2379_s12] ss:$0 sm:$0xff]  ;;  %s1649_s11 = scalar_lea.vmem %s1375_s8, 32 }
 0x21d   :  { %v1048_v45 = vrot.slane %v1030_v4, %v434_v20  ;;  %v1052_v6 = vrot.slane %v1031_v32, %v439_v56  ;;  %v1431_v32 = vld [vmem:[%s2381_s14] ss:$0 sm:$0xff]  ;;  %p1650_p6 = scmp.ne.s32.totalorder %s1375_s8, %s1649_s11  ;;  %p1655_p8 = scmp.lt.s32.totalorder %s1649_s11, %s1649_s11 }
 0x21f   :  { %v1053_v31 = vsel %vm441_vm4, %v1052_v6, %v1048_v45  ;;  %p1656_p9 = por %p1655_p8, %p1654_p7 }
 0x220   :  { %v1054_v38 = vsel %vm452_vm5, %v1053_v31, %v1044_v29 }
 0x221   :  { %v1056_v46 = vsel %vm455_vm6, %v1054_v38, 0.0  ;;  %p1657_p10 = pnand %p1656_p9, %p1650_p6 }
 0x222   :  { %1057 = vadd.xlane.f32.xlu1 %v1056_v46 }
 0x29d   :  { %v458_v50 = vpop.xlane.xlu1 %457 }
 0x29e   :  { %v459_v24 = vmul.f32 0.071428575, %v458_v50 }
 0x2a0   :  { %v1065_v57 = vmul.f32 %v1421_v44, %v459_v24 }
 0x2a5   :  { %v758_v0 = vpop.xlane.xlu0 %757 }
 0x2a6   :  { %v759_v8 = vmul.f32 0.071428575, %v758_v0 }
 0x2a8   :  { %v1071_v56 = vmul.f32 %v1422_v26, %v759_v8 }
 0x2aa   :  { %v1072_v5 = vadd.f32 %v1071_v56, %v1065_v57 }
 0x2af   :  { %v1058_v20 = vpop.xlane.xlu1 %1057 }
 0x2b0   :  { %v1059_v16 = vmul.f32 0.071428575, %v1058_v20 }
 0x2b2   :  { %v1078_v48 = vmul.f32 %v1423_v36, %v1059_v16 }
 0x2b4   :  { %v1079_v11 = vadd.f32 %v1078_v48, %v1072_v5 }
 0x2b6   :  { %v1087_v22 = vadd.f32 %v1424_v12, %v1079_v11 }
 0x2b8   :  { %1457 = vmatmul.mubr.msk.f32.vlgmr.msra.gmra.mrb[0].mxu0 %vm1099_vm8, %v1087_v22 }
 0x2b9   :  { %1478 = vmatprep.mubr.msk.f32.mxu0 %vm1700_vm7, %v1701_v51  ;;  %1495 = vmatpush3.bf16.msra.mxu0 %v1494_v18 }
 0x2ba   :  { %1496 = vmatprep.subr.bf16.mxu0 %v1699_v53 }
 0x2bd   :  { %1498 = vmatpush3.bf16.msra.mxu0 %v1497_v30 }
 0x38b   :  { %v1169_v41 = vpop.f32.mrb[0].mxu0 }
 0x38c   :  { %v1170_v23 = vadd.f32 %v1425_v60, %v1169_v41  ;;  %v1458_v59 = vpop.f32.mrb[1].mxu0 }
 0x38e   :  { %1468 = vmatmul.mubr.msk.f32.vlgmr.msra.gmra.mrb[0].mxu1 %vm1099_vm8, %v1170_v23 }
 0x461   :  { %v1253_v15 = vpop.f32.mrb[0].mxu1 }
 0x462   :  { %v1254_v27 = vadd.f32 %v1427_v1, %v1253_v15  ;;  %v1469_v3 = vpop.f32.mrb[1].mxu1 }
 0x464   :  { %v1258_v63 = vmul.f32 0.044715, %v1254_v27  ;;  %v1257_v33 = vmul.f32 0.5, %v1254_v27 }
 0x466   :  { %v1259_v55 = vmul.f32 %v1258_v63, %v1254_v27 }
 0x468   :  { %v1260_v58 = vmul.f32 %v1259_v55, %v1254_v27 }
 0x46a   :  { %v1261_v14 = vadd.f32 %v1260_v58, %v1254_v27 }
 0x46c   :  { %v1262_v7 = vmul.f32 0.7978846, %v1261_v14 }
 0x46e   :  { %1515 = vtanh.f32 %v1262_v7 }
 0x478   :  { %v1516_v42 = vpop.eup %1515 }
 0x479   :  { %v1264_v54 = vadd.f32 1.0, %v1516_v42 }
 0x47b   :  { %v1265_v37 = vmul.f32 %v1264_v54, %v1257_v33 }
 0x47d   :  { %v1273_v28 = vmul.f32 %v1429_v2, %v1265_v37 }
 0x47f   :  { %v1281_v4 = vadd.f32 %v1430_v10, %v1273_v28 }
 0x481   :  { %1479 = vmatmul.mubr.msk.f32.vlgmr.msra.gmra.mrb[2].mxu0 %vm1099_vm8, %v1281_v4 }
 0x554   :  { %v1362_v45 = vpop.f32.mrb[2].mxu0 }
 0x555   :  { %v1363_v6 = vadd.f32 %v1431_v32, %v1362_v45  ;;  %v1480_v29 = vpop.f32.mrb[3].mxu0 }
 0x557   :  { %1367 = vst.msk [vmem:[#allocation18] sm:$0x3] %vm1366_vm9, %v1363_v6 }
 0x558   :  { %1660 = shalt.err (!%p1657_p10)
}
 0x559   :  { %s1661_s24 = scalar_lea.hbm %s2382_s15, 32 }
 0x55a   :  { %p1662_p11 = scmp.ne.s32.totalorder %s2382_s15, %s1661_s24  ;;  %p1665_p12 = scmp.lt.u32.totalorder %s1661_s24, %s2382_s15 }
 0x55c   :  { %p1667_p13 = pnand %p1665_p12, %p1662_p11 }
 0x55e   :  { %1670 = shalt.err (!%p1667_p13)
}
 0x55f   :  { %1377 = dma.vmem_to_hbm [thread:$0]  %s1375_s8, 32, %s2382_s15, [#allocation4]  }
 0x560   :  { %1685 = dma.done.wait [#allocation4], 32  }
 0x561   :  { %1686 = vsyncadd [#allocation4], 4294967264 }
 0x562   :  { %1381 = vsyncpa [#allocation3], 1 }
 0x563   :  { %1382 = vsyncpa [#allocation14], 1 }
 0x564   :  { %1383 = vsyncpa [#allocation17], 1 }
 0x565   :  { %1384 = vsyncpa [#allocation4], 1 }
 0x566   :  { %1385 = vsyncpa [#allocation5], 1 }
 0x567   :  { %1386 = vsyncpa [#allocation11], 1 }
 0x568   :  { %1387 = vsyncpa [#allocation6], 1 }
 0x569   :  { %1388 = vsyncpa [#allocation8], 1 }

</bundles_post_ra>
